<compile_context>
chip_gen: v7x
topology: tpu7x:2x2x1
jax: 0.10.0
libtpu: 0.0.40
codegen_flags: <defaults>
</compile_context>

<pallas_src>
import math
import functools

import jax
import jax.numpy as jnp
from jax.experimental import pallas as pl
from jax.experimental.pallas import tpu as pltpu


def _cdiv(a: int, b: int) -> int:
    return (a + b - 1) // b


def _round_up(a: int, b: int) -> int:
    return _cdiv(a, b) * b


# ----------------------------------------------------------------------------
# Kernel: gather G embedding rows per grid step with manual row DMAs,
# double-buffered across the inner ("arbitrary") grid axis, then scale + store.
# ----------------------------------------------------------------------------
def _emb_gather_kernel(ids_ref, table_hbm, o_ref, rows_vmem, sems, *,
                       scale: float, tokens_per_step: int, num_inner: int):
    # ids_ref   : SMEM (N_pad,) int32      -- scalar-prefetched token ids
    # table_hbm : HBM  (V, D)              -- full table, never auto-tiled
    # o_ref     : VMEM (G, D)              -- lane/sublane-dense output block
    # rows_vmem : VMEM (2, G, D)           -- double-buffered gather scratch
    # sems      : DMA semaphores, shape (2,) -- one per scratch slot
    G = tokens_per_step
    outer = pl.program_id(0)
    inner = pl.program_id(1)
    step = outer * num_inner + inner          # global token-block index
    slot = inner % 2

    def start_fetch(step_idx, to_slot):
        base = step_idx * G
        # G independent row DMAs, all in flight at once; all signal the slot's
        # semaphore.  Each moves one (1, D) row HBM -> VMEM.
        for g in range(G):
            row = ids_ref[base + g]
            pltpu.make_async_copy(
                table_hbm.at[pl.ds(row, 1)],
                rows_vmem.at[to_slot, pl.ds(g, 1)],
                sems.at[to_slot],
            ).start()

    def wait_fetch(on_slot):
        # One wait per issued copy, with an identical-shape descriptor, so the
        # semaphore accounting exactly mirrors the starts.
        for g in range(G):
            pltpu.make_async_copy(
                table_hbm.at[pl.ds(0, 1)],
                rows_vmem.at[on_slot, pl.ds(g, 1)],
                sems.at[on_slot],
            ).wait()

    # Prime the pipeline at the start of every core's inner range.
    @pl.when(inner == 0)
    def _():
        start_fetch(step, 0)

    # Prefetch next step's rows into the other slot BEFORE waiting on ours,
    # so its HBM traffic overlaps this step's wait/scale/store.
    @pl.when(inner + 1 < num_inner)
    def _():
        start_fetch(step + 1, 1 - slot)

    wait_fetch(slot)

    rows = rows_vmem[slot]                                    # (G, D)
    # Scale in f32, cast on store (memory-bound kernel: the cast is free).
    o_ref[...] = (rows.astype(jnp.float32) * scale).astype(o_ref.dtype)


# ----------------------------------------------------------------------------
# Wrapper
# ----------------------------------------------------------------------------
def embeddings_forward(
    token_ids: jnp.ndarray,        # int tokens, shape [B, S]
    emb_table: jnp.ndarray,        # embedding weights, shape [vocab, d_model]
    *,
    tokens_per_step: int = 128,    # rows gathered per grid step (sweep 128-512)
    outer_chunks: int = 2,         # "parallel" outer axis (megacore on v7x)
) -> jnp.ndarray:                  # returns [B, S, d_model]
    B, S = token_ids.shape
    V, D = emb_table.shape
    dtype = emb_table.dtype
    scale = math.sqrt(float(D))
    N = B * S

    # ---- choose the per-step token block G ---------------------------------
    # Target up to ~2 MiB of gathered rows per step (amortizes the ~0.35 us
    # per-grid-step cost, keeps many row DMAs outstanding) while keeping the
    # double-buffered scratch + pipelined output block well inside v5e's
    # 16 MiB scoped-VMEM default (and v7x's 64 MiB/TC).  G stays a multiple of
    # 8 (f32 sublane pack) and never far larger than the actual token count.
    row_bytes = D * dtype.itemsize
    max_g_vmem = max(8, (2 * 1024 * 1024) // max(row_bytes, 1))
    G = max(1, min(int(tokens_per_step), int(max_g_vmem), _round_up(N, 8)))
    G = _round_up(G, 8)

    steps = _cdiv(N, G)
    num_outer = max(1, min(outer_chunks, steps))   # "parallel" -> megacore shard
    num_inner = _cdiv(steps, num_outer)            # "arbitrary" -> prefetch chain
    N_pad = num_outer * num_inner * G

    # TODO(synk): for very large B*S (>~64K tokens) chunk this call over the
    # token axis so the scalar-prefetched ids stay small in SMEM.
    ids = token_ids.reshape(N).astype(jnp.int32)
    if N_pad != N:
        ids = jnp.concatenate([ids, jnp.zeros((N_pad - N,), jnp.int32)])

    kernel = functools.partial(
        _emb_gather_kernel, scale=scale, tokens_per_step=G, num_inner=num_inner)

    out = pl.pallas_call(
        kernel,
        out_shape=jax.ShapeDtypeStruct((num_outer, num_inner, G, D), dtype),
        grid_spec=pltpu.PrefetchScalarGridSpec(
            num_scalar_prefetch=1,                       # token ids -> SMEM
            grid=(num_outer, num_inner),
            in_specs=[pl.BlockSpec(memory_space=pl.ANY)],  # table stays in HBM
            out_specs=pl.BlockSpec((None, None, G, D),
                                   lambda o, i, ids_ref: (o, i, 0, 0)),
            scratch_shapes=[
                pltpu.VMEM((2, G, D), dtype),            # double-buffered rows
                pltpu.SemaphoreType.DMA((2,)),           # one sem per slot
            ],
        ),
        compiler_params=pltpu.CompilerParams(
            dimension_semantics=("parallel", "arbitrary"),
        ),
    )(ids, emb_table)

    return out.reshape(N_pad, D)[:N].reshape(B, S, D)


# ----------------------------------------------------------------------------
# Demo / smoke test
# ----------------------------------------------------------------------------
if __name__ == "__main__":
    B, S = 2, 8
    VOCAB, D_MODEL = 64, 128     # D multiple of 128 -> lane-dense output stores

    key = jax.random.PRNGKey(0)
    k_ids, k_tab = jax.random.split(key)
    token_ids = jax.random.randint(k_ids, (B, S), 0, VOCAB, dtype=jnp.int32)
    emb_table = jax.random.normal(k_tab, (VOCAB, D_MODEL), dtype=jnp.float32)

    out = embeddings_forward(token_ids, emb_table)
    out = jax.block_until_ready(out)

    # reference: plain-JAX embedding lookup * sqrt(d_model)
    ref = emb_table[token_ids] * math.sqrt(D_MODEL)
    assert out.shape == (B, S, D_MODEL)
    assert jnp.allclose(out, ref, atol=1e-6, rtol=1e-6), "mismatch vs reference"

    print("KERNEL_OK")
</pallas_src>

<mosaic_0001>
module attributes {stable_mosaic.version = 11 : i64} {
  func.func @_emb_gather_kernel(%arg0: i32, %arg1: i32, %arg2: memref<16xi32, #tpu.memory_space<smem>>, %arg3: memref<64x128xf32, #tpu.memory_space<any>>, %arg4: memref<1x1x16x128xf32, #tpu.memory_space<vmem>>, %arg5: memref<2x16x128xf32, #tpu.memory_space<vmem>>, %arg6: memref<2x!tpu.dma_semaphore, #tpu.memory_space<semaphore_mem>>) attributes {dimension_semantics = [#tpu.dimension_semantics<parallel>, #tpu.dimension_semantics<arbitrary>], iteration_bounds = array<i64: 1, 1>, scalar_prefetch = 1 : i64, scratch_operands = 2 : i64, tpu.core_type = #tpu.core_type<tc>, window_params = [{}, {transform_indices = @transform_1, window_bounds = array<i64: 1, 1, 16, 128>}]} {
    %c1_i32 = arith.constant 1 : i32
    %0 = arith.muli %arg0, %c1_i32 : i32
    %1 = arith.addi %0, %arg1 : i32
    %c2_i32 = arith.constant 2 : i32
    %c0_i32 = arith.constant 0 : i32
    %2 = arith.cmpi eq, %c2_i32, %c0_i32 : i32
    %c1_i32_0 = arith.constant 1 : i32
    %3 = arith.select %2, %c1_i32_0, %c2_i32 : i32
    %4 = arith.remsi %arg1, %3 : i32
    %c0_i32_1 = arith.constant 0 : i32
    %5 = arith.cmpi ne, %4, %c0_i32_1 : i32
    %c0_i32_2 = arith.constant 0 : i32
    %6 = arith.cmpi slt, %4, %c0_i32_2 : i32
    %c0_i32_3 = arith.constant 0 : i32
    %7 = arith.cmpi slt, %3, %c0_i32_3 : i32
    %8 = arith.xori %6, %7 : i1
    %9 = arith.andi %8, %5 : i1
    %10 = arith.addi %4, %3 : i32
    %11 = arith.select %9, %10, %4 : i32
    %c0_i32_4 = arith.constant 0 : i32
    %12 = arith.cmpi eq, %arg1, %c0_i32_4 : i32
    %13 = arith.extui %12 : i1 to i32
    %c0_i32_5 = arith.constant 0 : i32
    %14 = arith.cmpi ne, %13, %c0_i32_5 : i32
    scf.if %14 {
      %c16_i32 = arith.constant 16 : i32
      %107 = arith.muli %1, %c16_i32 : i32
      %c0_i32_65 = arith.constant 0 : i32
      %108 = arith.addi %107, %c0_i32_65 : i32
      %109 = arith.index_cast %108 : i32 to index
      %110 = memref.load %arg2[%109] : memref<16xi32, #tpu.memory_space<smem>>
      %c0_i32_66 = arith.constant 0 : i32
      %c0_i32_67 = arith.constant 0 : i32
      %c0_i32_68 = arith.constant 0 : i32
      %111 = tpu.memref_slice %arg3[%110, %c0_i32_68] : memref<64x128xf32, #tpu.memory_space<any>> -> memref<1x128xf32, #tpu.memory_space<any>>
      %c0_i32_69 = arith.constant 0 : i32
      %c0_i32_70 = arith.constant 0 : i32
      %112 = tpu.memref_slice %arg5[%c0_i32_66, %c0_i32_69, %c0_i32_70] : memref<2x16x128xf32, #tpu.memory_space<vmem>> -> memref<1x1x128xf32, #tpu.memory_space<vmem>>
      %113 = tpu.memref_squeeze %112 : memref<1x1x128xf32, #tpu.memory_space<vmem>> -> memref<1x128xf32, #tpu.memory_space<vmem>>
      %114 = tpu.memref_slice %arg6[%c0_i32_67] : memref<2x!tpu.dma_semaphore, #tpu.memory_space<semaphore_mem>> -> memref<1x!tpu.dma_semaphore, #tpu.memory_space<semaphore_mem>>
      %115 = tpu.memref_squeeze %114 : memref<1x!tpu.dma_semaphore, #tpu.memory_space<semaphore_mem>> -> memref<!tpu.dma_semaphore, #tpu.memory_space<semaphore_mem>>
      tpu.enqueue_dma source(%111 : memref<1x128xf32, #tpu.memory_space<any>>) target(%113 : memref<1x128xf32, #tpu.memory_space<vmem>>) target_semaphore(%115 : memref<!tpu.dma_semaphore, #tpu.memory_space<semaphore_mem>>)
      %c1_i32_71 = arith.constant 1 : i32
      %116 = arith.addi %107, %c1_i32_71 : i32
      %117 = arith.index_cast %116 : i32 to index
      %118 = memref.load %arg2[%117] : memref<16xi32, #tpu.memory_space<smem>>
      %c0_i32_72 = arith.constant 0 : i32
      %c0_i32_73 = arith.constant 0 : i32
      %c0_i32_74 = arith.constant 0 : i32
      %119 = tpu.memref_slice %arg3[%118, %c0_i32_74] : memref<64x128xf32, #tpu.memory_space<any>> -> memref<1x128xf32, #tpu.memory_space<any>>
      %c1_i32_75 = arith.constant 1 : i32
      %c0_i32_76 = arith.constant 0 : i32
      %120 = tpu.memref_slice %arg5[%c0_i32_72, %c1_i32_75, %c0_i32_76] : memref<2x16x128xf32, #tpu.memory_space<vmem>> -> memref<1x1x128xf32, #tpu.memory_space<vmem>>
      %121 = tpu.memref_squeeze %120 : memref<1x1x128xf32, #tpu.memory_space<vmem>> -> memref<1x128xf32, #tpu.memory_space<vmem>>
      %122 = tpu.memref_slice %arg6[%c0_i32_73] : memref<2x!tpu.dma_semaphore, #tpu.memory_space<semaphore_mem>> -> memref<1x!tpu.dma_semaphore, #tpu.memory_space<semaphore_mem>>
      %123 = tpu.memref_squeeze %122 : memref<1x!tpu.dma_semaphore, #tpu.memory_space<semaphore_mem>> -> memref<!tpu.dma_semaphore, #tpu.memory_space<semaphore_mem>>
      tpu.enqueue_dma source(%119 : memref<1x128xf32, #tpu.memory_space<any>>) target(%121 : memref<1x128xf32, #tpu.memory_space<vmem>>) target_semaphore(%123 : memref<!tpu.dma_semaphore, #tpu.memory_space<semaphore_mem>>)
      %c2_i32_77 = arith.constant 2 : i32
      %124 = arith.addi %107, %c2_i32_77 : i32
      %125 = arith.index_cast %124 : i32 to index
      %126 = memref.load %arg2[%125] : memref<16xi32, #tpu.memory_space<smem>>
      %c0_i32_78 = arith.constant 0 : i32
      %c0_i32_79 = arith.constant 0 : i32
      %c0_i32_80 = arith.constant 0 : i32
      %127 = tpu.memref_slice %arg3[%126, %c0_i32_80] : memref<64x128xf32, #tpu.memory_space<any>> -> memref<1x128xf32, #tpu.memory_space<any>>
      %c2_i32_81 = arith.constant 2 : i32
      %c0_i32_82 = arith.constant 0 : i32
      %128 = tpu.memref_slice %arg5[%c0_i32_78, %c2_i32_81, %c0_i32_82] : memref<2x16x128xf32, #tpu.memory_space<vmem>> -> memref<1x1x128xf32, #tpu.memory_space<vmem>>
      %129 = tpu.memref_squeeze %128 : memref<1x1x128xf32, #tpu.memory_space<vmem>> -> memref<1x128xf32, #tpu.memory_space<vmem>>
      %130 = tpu.memref_slice %arg6[%c0_i32_79] : memref<2x!tpu.dma_semaphore, #tpu.memory_space<semaphore_mem>> -> memref<1x!tpu.dma_semaphore, #tpu.memory_space<semaphore_mem>>
      %131 = tpu.memref_squeeze %130 : memref<1x!tpu.dma_semaphore, #tpu.memory_space<semaphore_mem>> -> memref<!tpu.dma_semaphore, #tpu.memory_space<semaphore_mem>>
      tpu.enqueue_dma source(%127 : memref<1x128xf32, #tpu.memory_space<any>>) target(%129 : memref<1x128xf32, #tpu.memory_space<vmem>>) target_semaphore(%131 : memref<!tpu.dma_semaphore, #tpu.memory_space<semaphore_mem>>)
      %c3_i32_83 = arith.constant 3 : i32
      %132 = arith.addi %107, %c3_i32_83 : i32
      %133 = arith.index_cast %132 : i32 to index
      %134 = memref.load %arg2[%133] : memref<16xi32, #tpu.memory_space<smem>>
      %c0_i32_84 = arith.constant 0 : i32
      %c0_i32_85 = arith.constant 0 : i32
      %c0_i32_86 = arith.constant 0 : i32
      %135 = tpu.memref_slice %arg3[%134, %c0_i32_86] : memref<64x128xf32, #tpu.memory_space<any>> -> memref<1x128xf32, #tpu.memory_space<any>>
      %c3_i32_87 = arith.constant 3 : i32
      %c0_i32_88 = arith.constant 0 : i32
      %136 = tpu.memref_slice %arg5[%c0_i32_84, %c3_i32_87, %c0_i32_88] : memref<2x16x128xf32, #tpu.memory_space<vmem>> -> memref<1x1x128xf32, #tpu.memory_space<vmem>>
      %137 = tpu.memref_squeeze %136 : memref<1x1x128xf32, #tpu.memory_space<vmem>> -> memref<1x128xf32, #tpu.memory_space<vmem>>
      %138 = tpu.memref_slice %arg6[%c0_i32_85] : memref<2x!tpu.dma_semaphore, #tpu.memory_space<semaphore_mem>> -> memref<1x!tpu.dma_semaphore, #tpu.memory_space<semaphore_mem>>
      %139 = tpu.memref_squeeze %138 : memref<1x!tpu.dma_semaphore, #tpu.memory_space<semaphore_mem>> -> memref<!tpu.dma_semaphore, #tpu.memory_space<semaphore_mem>>
      tpu.enqueue_dma source(%135 : memref<1x128xf32, #tpu.memory_space<any>>) target(%137 : memref<1x128xf32, #tpu.memory_space<vmem>>) target_semaphore(%139 : memref<!tpu.dma_semaphore, #tpu.memory_space<semaphore_mem>>)
      %c4_i32_89 = arith.constant 4 : i32
      %140 = arith.addi %107, %c4_i32_89 : i32
      %141 = arith.index_cast %140 : i32 to index
      %142 = memref.load %arg2[%141] : memref<16xi32, #tpu.memory_space<smem>>
      %c0_i32_90 = arith.constant 0 : i32
      %c0_i32_91 = arith.constant 0 : i32
      %c0_i32_92 = arith.constant 0 : i32
      %143 = tpu.memref_slice %arg3[%142, %c0_i32_92] : memref<64x128xf32, #tpu.memory_space<any>> -> memref<1x128xf32, #tpu.memory_space<any>>
      %c4_i32_93 = arith.constant 4 : i32
      %c0_i32_94 = arith.constant 0 : i32
      %144 = tpu.memref_slice %arg5[%c0_i32_90, %c4_i32_93, %c0_i32_94] : memref<2x16x128xf32, #tpu.memory_space<vmem>> -> memref<1x1x128xf32, #tpu.memory_space<vmem>>
      %145 = tpu.memref_squeeze %144 : memref<1x1x128xf32, #tpu.memory_space<vmem>> -> memref<1x128xf32, #tpu.memory_space<vmem>>
      %146 = tpu.memref_slice %arg6[%c0_i32_91] : memref<2x!tpu.dma_semaphore, #tpu.memory_space<semaphore_mem>> -> memref<1x!tpu.dma_semaphore, #tpu.memory_space<semaphore_mem>>
      %147 = tpu.memref_squeeze %146 : memref<1x!tpu.dma_semaphore, #tpu.memory_space<semaphore_mem>> -> memref<!tpu.dma_semaphore, #tpu.memory_space<semaphore_mem>>
      tpu.enqueue_dma source(%143 : memref<1x128xf32, #tpu.memory_space<any>>) target(%145 : memref<1x128xf32, #tpu.memory_space<vmem>>) target_semaphore(%147 : memref<!tpu.dma_semaphore, #tpu.memory_space<semaphore_mem>>)
      %c5_i32_95 = arith.constant 5 : i32
      %148 = arith.addi %107, %c5_i32_95 : i32
      %149 = arith.index_cast %148 : i32 to index
      %150 = memref.load %arg2[%149] : memref<16xi32, #tpu.memory_space<smem>>
      %c0_i32_96 = arith.constant 0 : i32
      %c0_i32_97 = arith.constant 0 : i32
      %c0_i32_98 = arith.constant 0 : i32
      %151 = tpu.memref_slice %arg3[%150, %c0_i32_98] : memref<64x128xf32, #tpu.memory_space<any>> -> memref<1x128xf32, #tpu.memory_space<any>>
      %c5_i32_99 = arith.constant 5 : i32
      %c0_i32_100 = arith.constant 0 : i32
      %152 = tpu.memref_slice %arg5[%c0_i32_96, %c5_i32_99, %c0_i32_100] : memref<2x16x128xf32, #tpu.memory_space<vmem>> -> memref<1x1x128xf32, #tpu.memory_space<vmem>>
      %153 = tpu.memref_squeeze %152 : memref<1x1x128xf32, #tpu.memory_space<vmem>> -> memref<1x128xf32, #tpu.memory_space<vmem>>
      %154 = tpu.memref_slice %arg6[%c0_i32_97] : memref<2x!tpu.dma_semaphore, #tpu.memory_space<semaphore_mem>> -> memref<1x!tpu.dma_semaphore, #tpu.memory_space<semaphore_mem>>
      %155 = tpu.memref_squeeze %154 : memref<1x!tpu.dma_semaphore, #tpu.memory_space<semaphore_mem>> -> memref<!tpu.dma_semaphore, #tpu.memory_space<semaphore_mem>>
      tpu.enqueue_dma source(%151 : memref<1x128xf32, #tpu.memory_space<any>>) target(%153 : memref<1x128xf32, #tpu.memory_space<vmem>>) target_semaphore(%155 : memref<!tpu.dma_semaphore, #tpu.memory_space<semaphore_mem>>)
      %c6_i32_101 = arith.constant 6 : i32
      %156 = arith.addi %107, %c6_i32_101 : i32
      %157 = arith.index_cast %156 : i32 to index
      %158 = memref.load %arg2[%157] : memref<16xi32, #tpu.memory_space<smem>>
      %c0_i32_102 = arith.constant 0 : i32
      %c0_i32_103 = arith.constant 0 : i32
      %c0_i32_104 = arith.constant 0 : i32
      %159 = tpu.memref_slice %arg3[%158, %c0_i32_104] : memref<64x128xf32, #tpu.memory_space<any>> -> memref<1x128xf32, #tpu.memory_space<any>>
      %c6_i32_105 = arith.constant 6 : i32
      %c0_i32_106 = arith.constant 0 : i32
      %160 = tpu.memref_slice %arg5[%c0_i32_102, %c6_i32_105, %c0_i32_106] : memref<2x16x128xf32, #tpu.memory_space<vmem>> -> memref<1x1x128xf32, #tpu.memory_space<vmem>>
      %161 = tpu.memref_squeeze %160 : memref<1x1x128xf32, #tpu.memory_space<vmem>> -> memref<1x128xf32, #tpu.memory_space<vmem>>
      %162 = tpu.memref_slice %arg6[%c0_i32_103] : memref<2x!tpu.dma_semaphore, #tpu.memory_space<semaphore_mem>> -> memref<1x!tpu.dma_semaphore, #tpu.memory_space<semaphore_mem>>
      %163 = tpu.memref_squeeze %162 : memref<1x!tpu.dma_semaphore, #tpu.memory_space<semaphore_mem>> -> memref<!tpu.dma_semaphore, #tpu.memory_space<semaphore_mem>>
      tpu.enqueue_dma source(%159 : memref<1x128xf32, #tpu.memory_space<any>>) target(%161 : memref<1x128xf32, #tpu.memory_space<vmem>>) target_semaphore(%163 : memref<!tpu.dma_semaphore, #tpu.memory_space<semaphore_mem>>)
      %c7_i32_107 = arith.constant 7 : i32
      %164 = arith.addi %107, %c7_i32_107 : i32
      %165 = arith.index_cast %164 : i32 to index
      %166 = memref.load %arg2[%165] : memref<16xi32, #tpu.memory_space<smem>>
      %c0_i32_108 = arith.constant 0 : i32
      %c0_i32_109 = arith.constant 0 : i32
      %c0_i32_110 = arith.constant 0 : i32
      %167 = tpu.memref_slice %arg3[%166, %c0_i32_110] : memref<64x128xf32, #tpu.memory_space<any>> -> memref<1x128xf32, #tpu.memory_space<any>>
      %c7_i32_111 = arith.constant 7 : i32
      %c0_i32_112 = arith.constant 0 : i32
      %168 = tpu.memref_slice %arg5[%c0_i32_108, %c7_i32_111, %c0_i32_112] : memref<2x16x128xf32, #tpu.memory_space<vmem>> -> memref<1x1x128xf32, #tpu.memory_space<vmem>>
      %169 = tpu.memref_squeeze %168 : memref<1x1x128xf32, #tpu.memory_space<vmem>> -> memref<1x128xf32, #tpu.memory_space<vmem>>
      %170 = tpu.memref_slice %arg6[%c0_i32_109] : memref<2x!tpu.dma_semaphore, #tpu.memory_space<semaphore_mem>> -> memref<1x!tpu.dma_semaphore, #tpu.memory_space<semaphore_mem>>
      %171 = tpu.memref_squeeze %170 : memref<1x!tpu.dma_semaphore, #tpu.memory_space<semaphore_mem>> -> memref<!tpu.dma_semaphore, #tpu.memory_space<semaphore_mem>>
      tpu.enqueue_dma source(%167 : memref<1x128xf32, #tpu.memory_space<any>>) target(%169 : memref<1x128xf32, #tpu.memory_space<vmem>>) target_semaphore(%171 : memref<!tpu.dma_semaphore, #tpu.memory_space<semaphore_mem>>)
      %c8_i32_113 = arith.constant 8 : i32
      %172 = arith.addi %107, %c8_i32_113 : i32
      %173 = arith.index_cast %172 : i32 to index
      %174 = memref.load %arg2[%173] : memref<16xi32, #tpu.memory_space<smem>>
      %c0_i32_114 = arith.constant 0 : i32
      %c0_i32_115 = arith.constant 0 : i32
      %c0_i32_116 = arith.constant 0 : i32
      %175 = tpu.memref_slice %arg3[%174, %c0_i32_116] : memref<64x128xf32, #tpu.memory_space<any>> -> memref<1x128xf32, #tpu.memory_space<any>>
      %c8_i32_117 = arith.constant 8 : i32
      %c0_i32_118 = arith.constant 0 : i32
      %176 = tpu.memref_slice %arg5[%c0_i32_114, %c8_i32_117, %c0_i32_118] : memref<2x16x128xf32, #tpu.memory_space<vmem>> -> memref<1x1x128xf32, #tpu.memory_space<vmem>>
      %177 = tpu.memref_squeeze %176 : memref<1x1x128xf32, #tpu.memory_space<vmem>> -> memref<1x128xf32, #tpu.memory_space<vmem>>
      %178 = tpu.memref_slice %arg6[%c0_i32_115] : memref<2x!tpu.dma_semaphore, #tpu.memory_space<semaphore_mem>> -> memref<1x!tpu.dma_semaphore, #tpu.memory_space<semaphore_mem>>
      %179 = tpu.memref_squeeze %178 : memref<1x!tpu.dma_semaphore, #tpu.memory_space<semaphore_mem>> -> memref<!tpu.dma_semaphore, #tpu.memory_space<semaphore_mem>>
      tpu.enqueue_dma source(%175 : memref<1x128xf32, #tpu.memory_space<any>>) target(%177 : memref<1x128xf32, #tpu.memory_space<vmem>>) target_semaphore(%179 : memref<!tpu.dma_semaphore, #tpu.memory_space<semaphore_mem>>)
      %c9_i32_119 = arith.constant 9 : i32
      %180 = arith.addi %107, %c9_i32_119 : i32
      %181 = arith.index_cast %180 : i32 to index
      %182 = memref.load %arg2[%181] : memref<16xi32, #tpu.memory_space<smem>>
      %c0_i32_120 = arith.constant 0 : i32
      %c0_i32_121 = arith.constant 0 : i32
      %c0_i32_122 = arith.constant 0 : i32
      %183 = tpu.memref_slice %arg3[%182, %c0_i32_122] : memref<64x128xf32, #tpu.memory_space<any>> -> memref<1x128xf32, #tpu.memory_space<any>>
      %c9_i32_123 = arith.constant 9 : i32
      %c0_i32_124 = arith.constant 0 : i32
      %184 = tpu.memref_slice %arg5[%c0_i32_120, %c9_i32_123, %c0_i32_124] : memref<2x16x128xf32, #tpu.memory_space<vmem>> -> memref<1x1x128xf32, #tpu.memory_space<vmem>>
      %185 = tpu.memref_squeeze %184 : memref<1x1x128xf32, #tpu.memory_space<vmem>> -> memref<1x128xf32, #tpu.memory_space<vmem>>
      %186 = tpu.memref_slice %arg6[%c0_i32_121] : memref<2x!tpu.dma_semaphore, #tpu.memory_space<semaphore_mem>> -> memref<1x!tpu.dma_semaphore, #tpu.memory_space<semaphore_mem>>
      %187 = tpu.memref_squeeze %186 : memref<1x!tpu.dma_semaphore, #tpu.memory_space<semaphore_mem>> -> memref<!tpu.dma_semaphore, #tpu.memory_space<semaphore_mem>>
      tpu.enqueue_dma source(%183 : memref<1x128xf32, #tpu.memory_space<any>>) target(%185 : memref<1x128xf32, #tpu.memory_space<vmem>>) target_semaphore(%187 : memref<!tpu.dma_semaphore, #tpu.memory_space<semaphore_mem>>)
      %c10_i32_125 = arith.constant 10 : i32
      %188 = arith.addi %107, %c10_i32_125 : i32
      %189 = arith.index_cast %188 : i32 to index
      %190 = memref.load %arg2[%189] : memref<16xi32, #tpu.memory_space<smem>>
      %c0_i32_126 = arith.constant 0 : i32
      %c0_i32_127 = arith.constant 0 : i32
      %c0_i32_128 = arith.constant 0 : i32
      %191 = tpu.memref_slice %arg3[%190, %c0_i32_128] : memref<64x128xf32, #tpu.memory_space<any>> -> memref<1x128xf32, #tpu.memory_space<any>>
      %c10_i32_129 = arith.constant 10 : i32
      %c0_i32_130 = arith.constant 0 : i32
      %192 = tpu.memref_slice %arg5[%c0_i32_126, %c10_i32_129, %c0_i32_130] : memref<2x16x128xf32, #tpu.memory_space<vmem>> -> memref<1x1x128xf32, #tpu.memory_space<vmem>>
      %193 = tpu.memref_squeeze %192 : memref<1x1x128xf32, #tpu.memory_space<vmem>> -> memref<1x128xf32, #tpu.memory_space<vmem>>
      %194 = tpu.memref_slice %arg6[%c0_i32_127] : memref<2x!tpu.dma_semaphore, #tpu.memory_space<semaphore_mem>> -> memref<1x!tpu.dma_semaphore, #tpu.memory_space<semaphore_mem>>
      %195 = tpu.memref_squeeze %194 : memref<1x!tpu.dma_semaphore, #tpu.memory_space<semaphore_mem>> -> memref<!tpu.dma_semaphore, #tpu.memory_space<semaphore_mem>>
      tpu.enqueue_dma source(%191 : memref<1x128xf32, #tpu.memory_space<any>>) target(%193 : memref<1x128xf32, #tpu.memory_space<vmem>>) target_semaphore(%195 : memref<!tpu.dma_semaphore, #tpu.memory_space<semaphore_mem>>)
      %c11_i32_131 = arith.constant 11 : i32
      %196 = arith.addi %107, %c11_i32_131 : i32
      %197 = arith.index_cast %196 : i32 to index
      %198 = memref.load %arg2[%197] : memref<16xi32, #tpu.memory_space<smem>>
      %c0_i32_132 = arith.constant 0 : i32
      %c0_i32_133 = arith.constant 0 : i32
      %c0_i32_134 = arith.constant 0 : i32
      %199 = tpu.memref_slice %arg3[%198, %c0_i32_134] : memref<64x128xf32, #tpu.memory_space<any>> -> memref<1x128xf32, #tpu.memory_space<any>>
      %c11_i32_135 = arith.constant 11 : i32
      %c0_i32_136 = arith.constant 0 : i32
      %200 = tpu.memref_slice %arg5[%c0_i32_132, %c11_i32_135, %c0_i32_136] : memref<2x16x128xf32, #tpu.memory_space<vmem>> -> memref<1x1x128xf32, #tpu.memory_space<vmem>>
      %201 = tpu.memref_squeeze %200 : memref<1x1x128xf32, #tpu.memory_space<vmem>> -> memref<1x128xf32, #tpu.memory_space<vmem>>
      %202 = tpu.memref_slice %arg6[%c0_i32_133] : memref<2x!tpu.dma_semaphore, #tpu.memory_space<semaphore_mem>> -> memref<1x!tpu.dma_semaphore, #tpu.memory_space<semaphore_mem>>
      %203 = tpu.memref_squeeze %202 : memref<1x!tpu.dma_semaphore, #tpu.memory_space<semaphore_mem>> -> memref<!tpu.dma_semaphore, #tpu.memory_space<semaphore_mem>>
      tpu.enqueue_dma source(%199 : memref<1x128xf32, #tpu.memory_space<any>>) target(%201 : memref<1x128xf32, #tpu.memory_space<vmem>>) target_semaphore(%203 : memref<!tpu.dma_semaphore, #tpu.memory_space<semaphore_mem>>)
      %c12_i32_137 = arith.constant 12 : i32
      %204 = arith.addi %107, %c12_i32_137 : i32
      %205 = arith.index_cast %204 : i32 to index
      %206 = memref.load %arg2[%205] : memref<16xi32, #tpu.memory_space<smem>>
      %c0_i32_138 = arith.constant 0 : i32
      %c0_i32_139 = arith.constant 0 : i32
      %c0_i32_140 = arith.constant 0 : i32
      %207 = tpu.memref_slice %arg3[%206, %c0_i32_140] : memref<64x128xf32, #tpu.memory_space<any>> -> memref<1x128xf32, #tpu.memory_space<any>>
      %c12_i32_141 = arith.constant 12 : i32
      %c0_i32_142 = arith.constant 0 : i32
      %208 = tpu.memref_slice %arg5[%c0_i32_138, %c12_i32_141, %c0_i32_142] : memref<2x16x128xf32, #tpu.memory_space<vmem>> -> memref<1x1x128xf32, #tpu.memory_space<vmem>>
      %209 = tpu.memref_squeeze %208 : memref<1x1x128xf32, #tpu.memory_space<vmem>> -> memref<1x128xf32, #tpu.memory_space<vmem>>
      %210 = tpu.memref_slice %arg6[%c0_i32_139] : memref<2x!tpu.dma_semaphore, #tpu.memory_space<semaphore_mem>> -> memref<1x!tpu.dma_semaphore, #tpu.memory_space<semaphore_mem>>
      %211 = tpu.memref_squeeze %210 : memref<1x!tpu.dma_semaphore, #tpu.memory_space<semaphore_mem>> -> memref<!tpu.dma_semaphore, #tpu.memory_space<semaphore_mem>>
      tpu.enqueue_dma source(%207 : memref<1x128xf32, #tpu.memory_space<any>>) target(%209 : memref<1x128xf32, #tpu.memory_space<vmem>>) target_semaphore(%211 : memref<!tpu.dma_semaphore, #tpu.memory_space<semaphore_mem>>)
      %c13_i32_143 = arith.constant 13 : i32
      %212 = arith.addi %107, %c13_i32_143 : i32
      %213 = arith.index_cast %212 : i32 to index
      %214 = memref.load %arg2[%213] : memref<16xi32, #tpu.memory_space<smem>>
      %c0_i32_144 = arith.constant 0 : i32
      %c0_i32_145 = arith.constant 0 : i32
      %c0_i32_146 = arith.constant 0 : i32
      %215 = tpu.memref_slice %arg3[%214, %c0_i32_146] : memref<64x128xf32, #tpu.memory_space<any>> -> memref<1x128xf32, #tpu.memory_space<any>>
      %c13_i32_147 = arith.constant 13 : i32
      %c0_i32_148 = arith.constant 0 : i32
      %216 = tpu.memref_slice %arg5[%c0_i32_144, %c13_i32_147, %c0_i32_148] : memref<2x16x128xf32, #tpu.memory_space<vmem>> -> memref<1x1x128xf32, #tpu.memory_space<vmem>>
      %217 = tpu.memref_squeeze %216 : memref<1x1x128xf32, #tpu.memory_space<vmem>> -> memref<1x128xf32, #tpu.memory_space<vmem>>
      %218 = tpu.memref_slice %arg6[%c0_i32_145] : memref<2x!tpu.dma_semaphore, #tpu.memory_space<semaphore_mem>> -> memref<1x!tpu.dma_semaphore, #tpu.memory_space<semaphore_mem>>
      %219 = tpu.memref_squeeze %218 : memref<1x!tpu.dma_semaphore, #tpu.memory_space<semaphore_mem>> -> memref<!tpu.dma_semaphore, #tpu.memory_space<semaphore_mem>>
      tpu.enqueue_dma source(%215 : memref<1x128xf32, #tpu.memory_space<any>>) target(%217 : memref<1x128xf32, #tpu.memory_space<vmem>>) target_semaphore(%219 : memref<!tpu.dma_semaphore, #tpu.memory_space<semaphore_mem>>)
      %c14_i32_149 = arith.constant 14 : i32
      %220 = arith.addi %107, %c14_i32_149 : i32
      %221 = arith.index_cast %220 : i32 to index
      %222 = memref.load %arg2[%221] : memref<16xi32, #tpu.memory_space<smem>>
      %c0_i32_150 = arith.constant 0 : i32
      %c0_i32_151 = arith.constant 0 : i32
      %c0_i32_152 = arith.constant 0 : i32
      %223 = tpu.memref_slice %arg3[%222, %c0_i32_152] : memref<64x128xf32, #tpu.memory_space<any>> -> memref<1x128xf32, #tpu.memory_space<any>>
      %c14_i32_153 = arith.constant 14 : i32
      %c0_i32_154 = arith.constant 0 : i32
      %224 = tpu.memref_slice %arg5[%c0_i32_150, %c14_i32_153, %c0_i32_154] : memref<2x16x128xf32, #tpu.memory_space<vmem>> -> memref<1x1x128xf32, #tpu.memory_space<vmem>>
      %225 = tpu.memref_squeeze %224 : memref<1x1x128xf32, #tpu.memory_space<vmem>> -> memref<1x128xf32, #tpu.memory_space<vmem>>
      %226 = tpu.memref_slice %arg6[%c0_i32_151] : memref<2x!tpu.dma_semaphore, #tpu.memory_space<semaphore_mem>> -> memref<1x!tpu.dma_semaphore, #tpu.memory_space<semaphore_mem>>
      %227 = tpu.memref_squeeze %226 : memref<1x!tpu.dma_semaphore, #tpu.memory_space<semaphore_mem>> -> memref<!tpu.dma_semaphore, #tpu.memory_space<semaphore_mem>>
      tpu.enqueue_dma source(%223 : memref<1x128xf32, #tpu.memory_space<any>>) target(%225 : memref<1x128xf32, #tpu.memory_space<vmem>>) target_semaphore(%227 : memref<!tpu.dma_semaphore, #tpu.memory_space<semaphore_mem>>)
      %c15_i32_155 = arith.constant 15 : i32
      %228 = arith.addi %107, %c15_i32_155 : i32
      %229 = arith.index_cast %228 : i32 to index
      %230 = memref.load %arg2[%229] : memref<16xi32, #tpu.memory_space<smem>>
      %c0_i32_156 = arith.constant 0 : i32
      %c0_i32_157 = arith.constant 0 : i32
      %c0_i32_158 = arith.constant 0 : i32
      %231 = tpu.memref_slice %arg3[%230, %c0_i32_158] : memref<64x128xf32, #tpu.memory_space<any>> -> memref<1x128xf32, #tpu.memory_space<any>>
      %c15_i32_159 = arith.constant 15 : i32
      %c0_i32_160 = arith.constant 0 : i32
      %232 = tpu.memref_slice %arg5[%c0_i32_156, %c15_i32_159, %c0_i32_160] : memref<2x16x128xf32, #tpu.memory_space<vmem>> -> memref<1x1x128xf32, #tpu.memory_space<vmem>>
      %233 = tpu.memref_squeeze %232 : memref<1x1x128xf32, #tpu.memory_space<vmem>> -> memref<1x128xf32, #tpu.memory_space<vmem>>
      %234 = tpu.memref_slice %arg6[%c0_i32_157] : memref<2x!tpu.dma_semaphore, #tpu.memory_space<semaphore_mem>> -> memref<1x!tpu.dma_semaphore, #tpu.memory_space<semaphore_mem>>
      %235 = tpu.memref_squeeze %234 : memref<1x!tpu.dma_semaphore, #tpu.memory_space<semaphore_mem>> -> memref<!tpu.dma_semaphore, #tpu.memory_space<semaphore_mem>>
      tpu.enqueue_dma source(%231 : memref<1x128xf32, #tpu.memory_space<any>>) target(%233 : memref<1x128xf32, #tpu.memory_space<vmem>>) target_semaphore(%235 : memref<!tpu.dma_semaphore, #tpu.memory_space<semaphore_mem>>)
    } else {
    }
    %c1_i32_6 = arith.constant 1 : i32
    %15 = arith.addi %arg1, %c1_i32_6 : i32
    %c1_i32_7 = arith.constant 1 : i32
    %16 = arith.cmpi slt, %15, %c1_i32_7 : i32
    %17 = arith.extui %16 : i1 to i32
    %c0_i32_8 = arith.constant 0 : i32
    %18 = arith.cmpi ne, %17, %c0_i32_8 : i32
    scf.if %18 {
      %c1_i32_65 = arith.constant 1 : i32
      %107 = arith.addi %1, %c1_i32_65 : i32
      %c1_i32_66 = arith.constant 1 : i32
      %108 = arith.subi %c1_i32_66, %11 : i32
      %c16_i32 = arith.constant 16 : i32
      %109 = arith.muli %107, %c16_i32 : i32
      %c0_i32_67 = arith.constant 0 : i32
      %110 = arith.addi %109, %c0_i32_67 : i32
      %111 = arith.index_cast %110 : i32 to index
      %112 = memref.load %arg2[%111] : memref<16xi32, #tpu.memory_space<smem>>
      %c0_i32_68 = arith.constant 0 : i32
      %113 = tpu.memref_slice %arg3[%112, %c0_i32_68] : memref<64x128xf32, #tpu.memory_space<any>> -> memref<1x128xf32, #tpu.memory_space<any>>
      %c0_i32_69 = arith.constant 0 : i32
      %c0_i32_70 = arith.constant 0 : i32
      %114 = tpu.memref_slice %arg5[%108, %c0_i32_69, %c0_i32_70] : memref<2x16x128xf32, #tpu.memory_space<vmem>> -> memref<1x1x128xf32, #tpu.memory_space<vmem>>
      %115 = tpu.memref_squeeze %114 : memref<1x1x128xf32, #tpu.memory_space<vmem>> -> memref<1x128xf32, #tpu.memory_space<vmem>>
      %116 = tpu.memref_slice %arg6[%108] : memref<2x!tpu.dma_semaphore, #tpu.memory_space<semaphore_mem>> -> memref<1x!tpu.dma_semaphore, #tpu.memory_space<semaphore_mem>>
      %117 = tpu.memref_squeeze %116 : memref<1x!tpu.dma_semaphore, #tpu.memory_space<semaphore_mem>> -> memref<!tpu.dma_semaphore, #tpu.memory_space<semaphore_mem>>
      tpu.enqueue_dma source(%113 : memref<1x128xf32, #tpu.memory_space<any>>) target(%115 : memref<1x128xf32, #tpu.memory_space<vmem>>) target_semaphore(%117 : memref<!tpu.dma_semaphore, #tpu.memory_space<semaphore_mem>>)
      %c1_i32_71 = arith.constant 1 : i32
      %118 = arith.addi %109, %c1_i32_71 : i32
      %119 = arith.index_cast %118 : i32 to index
      %120 = memref.load %arg2[%119] : memref<16xi32, #tpu.memory_space<smem>>
      %c0_i32_72 = arith.constant 0 : i32
      %121 = tpu.memref_slice %arg3[%120, %c0_i32_72] : memref<64x128xf32, #tpu.memory_space<any>> -> memref<1x128xf32, #tpu.memory_space<any>>
      %c1_i32_73 = arith.constant 1 : i32
      %c0_i32_74 = arith.constant 0 : i32
      %122 = tpu.memref_slice %arg5[%108, %c1_i32_73, %c0_i32_74] : memref<2x16x128xf32, #tpu.memory_space<vmem>> -> memref<1x1x128xf32, #tpu.memory_space<vmem>>
      %123 = tpu.memref_squeeze %122 : memref<1x1x128xf32, #tpu.memory_space<vmem>> -> memref<1x128xf32, #tpu.memory_space<vmem>>
      %124 = tpu.memref_slice %arg6[%108] : memref<2x!tpu.dma_semaphore, #tpu.memory_space<semaphore_mem>> -> memref<1x!tpu.dma_semaphore, #tpu.memory_space<semaphore_mem>>
      %125 = tpu.memref_squeeze %124 : memref<1x!tpu.dma_semaphore, #tpu.memory_space<semaphore_mem>> -> memref<!tpu.dma_semaphore, #tpu.memory_space<semaphore_mem>>
      tpu.enqueue_dma source(%121 : memref<1x128xf32, #tpu.memory_space<any>>) target(%123 : memref<1x128xf32, #tpu.memory_space<vmem>>) target_semaphore(%125 : memref<!tpu.dma_semaphore, #tpu.memory_space<semaphore_mem>>)
      %c2_i32_75 = arith.constant 2 : i32
      %126 = arith.addi %109, %c2_i32_75 : i32
      %127 = arith.index_cast %126 : i32 to index
      %128 = memref.load %arg2[%127] : memref<16xi32, #tpu.memory_space<smem>>
      %c0_i32_76 = arith.constant 0 : i32
      %129 = tpu.memref_slice %arg3[%128, %c0_i32_76] : memref<64x128xf32, #tpu.memory_space<any>> -> memref<1x128xf32, #tpu.memory_space<any>>
      %c2_i32_77 = arith.constant 2 : i32
      %c0_i32_78 = arith.constant 0 : i32
      %130 = tpu.memref_slice %arg5[%108, %c2_i32_77, %c0_i32_78] : memref<2x16x128xf32, #tpu.memory_space<vmem>> -> memref<1x1x128xf32, #tpu.memory_space<vmem>>
      %131 = tpu.memref_squeeze %130 : memref<1x1x128xf32, #tpu.memory_space<vmem>> -> memref<1x128xf32, #tpu.memory_space<vmem>>
      %132 = tpu.memref_slice %arg6[%108] : memref<2x!tpu.dma_semaphore, #tpu.memory_space<semaphore_mem>> -> memref<1x!tpu.dma_semaphore, #tpu.memory_space<semaphore_mem>>
      %133 = tpu.memref_squeeze %132 : memref<1x!tpu.dma_semaphore, #tpu.memory_space<semaphore_mem>> -> memref<!tpu.dma_semaphore, #tpu.memory_space<semaphore_mem>>
      tpu.enqueue_dma source(%129 : memref<1x128xf32, #tpu.memory_space<any>>) target(%131 : memref<1x128xf32, #tpu.memory_space<vmem>>) target_semaphore(%133 : memref<!tpu.dma_semaphore, #tpu.memory_space<semaphore_mem>>)
      %c3_i32_79 = arith.constant 3 : i32
      %134 = arith.addi %109, %c3_i32_79 : i32
      %135 = arith.index_cast %134 : i32 to index
      %136 = memref.load %arg2[%135] : memref<16xi32, #tpu.memory_space<smem>>
      %c0_i32_80 = arith.constant 0 : i32
      %137 = tpu.memref_slice %arg3[%136, %c0_i32_80] : memref<64x128xf32, #tpu.memory_space<any>> -> memref<1x128xf32, #tpu.memory_space<any>>
      %c3_i32_81 = arith.constant 3 : i32
      %c0_i32_82 = arith.constant 0 : i32
      %138 = tpu.memref_slice %arg5[%108, %c3_i32_81, %c0_i32_82] : memref<2x16x128xf32, #tpu.memory_space<vmem>> -> memref<1x1x128xf32, #tpu.memory_space<vmem>>
      %139 = tpu.memref_squeeze %138 : memref<1x1x128xf32, #tpu.memory_space<vmem>> -> memref<1x128xf32, #tpu.memory_space<vmem>>
      %140 = tpu.memref_slice %arg6[%108] : memref<2x!tpu.dma_semaphore, #tpu.memory_space<semaphore_mem>> -> memref<1x!tpu.dma_semaphore, #tpu.memory_space<semaphore_mem>>
      %141 = tpu.memref_squeeze %140 : memref<1x!tpu.dma_semaphore, #tpu.memory_space<semaphore_mem>> -> memref<!tpu.dma_semaphore, #tpu.memory_space<semaphore_mem>>
      tpu.enqueue_dma source(%137 : memref<1x128xf32, #tpu.memory_space<any>>) target(%139 : memref<1x128xf32, #tpu.memory_space<vmem>>) target_semaphore(%141 : memref<!tpu.dma_semaphore, #tpu.memory_space<semaphore_mem>>)
      %c4_i32_83 = arith.constant 4 : i32
      %142 = arith.addi %109, %c4_i32_83 : i32
      %143 = arith.index_cast %142 : i32 to index
      %144 = memref.load %arg2[%143] : memref<16xi32, #tpu.memory_space<smem>>
      %c0_i32_84 = arith.constant 0 : i32
      %145 = tpu.memref_slice %arg3[%144, %c0_i32_84] : memref<64x128xf32, #tpu.memory_space<any>> -> memref<1x128xf32, #tpu.memory_space<any>>
      %c4_i32_85 = arith.constant 4 : i32
      %c0_i32_86 = arith.constant 0 : i32
      %146 = tpu.memref_slice %arg5[%108, %c4_i32_85, %c0_i32_86] : memref<2x16x128xf32, #tpu.memory_space<vmem>> -> memref<1x1x128xf32, #tpu.memory_space<vmem>>
      %147 = tpu.memref_squeeze %146 : memref<1x1x128xf32, #tpu.memory_space<vmem>> -> memref<1x128xf32, #tpu.memory_space<vmem>>
      %148 = tpu.memref_slice %arg6[%108] : memref<2x!tpu.dma_semaphore, #tpu.memory_space<semaphore_mem>> -> memref<1x!tpu.dma_semaphore, #tpu.memory_space<semaphore_mem>>
      %149 = tpu.memref_squeeze %148 : memref<1x!tpu.dma_semaphore, #tpu.memory_space<semaphore_mem>> -> memref<!tpu.dma_semaphore, #tpu.memory_space<semaphore_mem>>
      tpu.enqueue_dma source(%145 : memref<1x128xf32, #tpu.memory_space<any>>) target(%147 : memref<1x128xf32, #tpu.memory_space<vmem>>) target_semaphore(%149 : memref<!tpu.dma_semaphore, #tpu.memory_space<semaphore_mem>>)
      %c5_i32_87 = arith.constant 5 : i32
      %150 = arith.addi %109, %c5_i32_87 : i32
      %151 = arith.index_cast %150 : i32 to index
      %152 = memref.load %arg2[%151] : memref<16xi32, #tpu.memory_space<smem>>
      %c0_i32_88 = arith.constant 0 : i32
      %153 = tpu.memref_slice %arg3[%152, %c0_i32_88] : memref<64x128xf32, #tpu.memory_space<any>> -> memref<1x128xf32, #tpu.memory_space<any>>
      %c5_i32_89 = arith.constant 5 : i32
      %c0_i32_90 = arith.constant 0 : i32
      %154 = tpu.memref_slice %arg5[%108, %c5_i32_89, %c0_i32_90] : memref<2x16x128xf32, #tpu.memory_space<vmem>> -> memref<1x1x128xf32, #tpu.memory_space<vmem>>
      %155 = tpu.memref_squeeze %154 : memref<1x1x128xf32, #tpu.memory_space<vmem>> -> memref<1x128xf32, #tpu.memory_space<vmem>>
      %156 = tpu.memref_slice %arg6[%108] : memref<2x!tpu.dma_semaphore, #tpu.memory_space<semaphore_mem>> -> memref<1x!tpu.dma_semaphore, #tpu.memory_space<semaphore_mem>>
      %157 = tpu.memref_squeeze %156 : memref<1x!tpu.dma_semaphore, #tpu.memory_space<semaphore_mem>> -> memref<!tpu.dma_semaphore, #tpu.memory_space<semaphore_mem>>
      tpu.enqueue_dma source(%153 : memref<1x128xf32, #tpu.memory_space<any>>) target(%155 : memref<1x128xf32, #tpu.memory_space<vmem>>) target_semaphore(%157 : memref<!tpu.dma_semaphore, #tpu.memory_space<semaphore_mem>>)
      %c6_i32_91 = arith.constant 6 : i32
      %158 = arith.addi %109, %c6_i32_91 : i32
      %159 = arith.index_cast %158 : i32 to index
      %160 = memref.load %arg2[%159] : memref<16xi32, #tpu.memory_space<smem>>
      %c0_i32_92 = arith.constant 0 : i32
      %161 = tpu.memref_slice %arg3[%160, %c0_i32_92] : memref<64x128xf32, #tpu.memory_space<any>> -> memref<1x128xf32, #tpu.memory_space<any>>
      %c6_i32_93 = arith.constant 6 : i32
      %c0_i32_94 = arith.constant 0 : i32
      %162 = tpu.memref_slice %arg5[%108, %c6_i32_93, %c0_i32_94] : memref<2x16x128xf32, #tpu.memory_space<vmem>> -> memref<1x1x128xf32, #tpu.memory_space<vmem>>
      %163 = tpu.memref_squeeze %162 : memref<1x1x128xf32, #tpu.memory_space<vmem>> -> memref<1x128xf32, #tpu.memory_space<vmem>>
      %164 = tpu.memref_slice %arg6[%108] : memref<2x!tpu.dma_semaphore, #tpu.memory_space<semaphore_mem>> -> memref<1x!tpu.dma_semaphore, #tpu.memory_space<semaphore_mem>>
      %165 = tpu.memref_squeeze %164 : memref<1x!tpu.dma_semaphore, #tpu.memory_space<semaphore_mem>> -> memref<!tpu.dma_semaphore, #tpu.memory_space<semaphore_mem>>
      tpu.enqueue_dma source(%161 : memref<1x128xf32, #tpu.memory_space<any>>) target(%163 : memref<1x128xf32, #tpu.memory_space<vmem>>) target_semaphore(%165 : memref<!tpu.dma_semaphore, #tpu.memory_space<semaphore_mem>>)
      %c7_i32_95 = arith.constant 7 : i32
      %166 = arith.addi %109, %c7_i32_95 : i32
      %167 = arith.index_cast %166 : i32 to index
      %168 = memref.load %arg2[%167] : memref<16xi32, #tpu.memory_space<smem>>
      %c0_i32_96 = arith.constant 0 : i32
      %169 = tpu.memref_slice %arg3[%168, %c0_i32_96] : memref<64x128xf32, #tpu.memory_space<any>> -> memref<1x128xf32, #tpu.memory_space<any>>
      %c7_i32_97 = arith.constant 7 : i32
      %c0_i32_98 = arith.constant 0 : i32
      %170 = tpu.memref_slice %arg5[%108, %c7_i32_97, %c0_i32_98] : memref<2x16x128xf32, #tpu.memory_space<vmem>> -> memref<1x1x128xf32, #tpu.memory_space<vmem>>
      %171 = tpu.memref_squeeze %170 : memref<1x1x128xf32, #tpu.memory_space<vmem>> -> memref<1x128xf32, #tpu.memory_space<vmem>>
      %172 = tpu.memref_slice %arg6[%108] : memref<2x!tpu.dma_semaphore, #tpu.memory_space<semaphore_mem>> -> memref<1x!tpu.dma_semaphore, #tpu.memory_space<semaphore_mem>>
      %173 = tpu.memref_squeeze %172 : memref<1x!tpu.dma_semaphore, #tpu.memory_space<semaphore_mem>> -> memref<!tpu.dma_semaphore, #tpu.memory_space<semaphore_mem>>
      tpu.enqueue_dma source(%169 : memref<1x128xf32, #tpu.memory_space<any>>) target(%171 : memref<1x128xf32, #tpu.memory_space<vmem>>) target_semaphore(%173 : memref<!tpu.dma_semaphore, #tpu.memory_space<semaphore_mem>>)
      %c8_i32_99 = arith.constant 8 : i32
      %174 = arith.addi %109, %c8_i32_99 : i32
      %175 = arith.index_cast %174 : i32 to index
      %176 = memref.load %arg2[%175] : memref<16xi32, #tpu.memory_space<smem>>
      %c0_i32_100 = arith.constant 0 : i32
      %177 = tpu.memref_slice %arg3[%176, %c0_i32_100] : memref<64x128xf32, #tpu.memory_space<any>> -> memref<1x128xf32, #tpu.memory_space<any>>
      %c8_i32_101 = arith.constant 8 : i32
      %c0_i32_102 = arith.constant 0 : i32
      %178 = tpu.memref_slice %arg5[%108, %c8_i32_101, %c0_i32_102] : memref<2x16x128xf32, #tpu.memory_space<vmem>> -> memref<1x1x128xf32, #tpu.memory_space<vmem>>
      %179 = tpu.memref_squeeze %178 : memref<1x1x128xf32, #tpu.memory_space<vmem>> -> memref<1x128xf32, #tpu.memory_space<vmem>>
      %180 = tpu.memref_slice %arg6[%108] : memref<2x!tpu.dma_semaphore, #tpu.memory_space<semaphore_mem>> -> memref<1x!tpu.dma_semaphore, #tpu.memory_space<semaphore_mem>>
      %181 = tpu.memref_squeeze %180 : memref<1x!tpu.dma_semaphore, #tpu.memory_space<semaphore_mem>> -> memref<!tpu.dma_semaphore, #tpu.memory_space<semaphore_mem>>
      tpu.enqueue_dma source(%177 : memref<1x128xf32, #tpu.memory_space<any>>) target(%179 : memref<1x128xf32, #tpu.memory_space<vmem>>) target_semaphore(%181 : memref<!tpu.dma_semaphore, #tpu.memory_space<semaphore_mem>>)
      %c9_i32_103 = arith.constant 9 : i32
      %182 = arith.addi %109, %c9_i32_103 : i32
      %183 = arith.index_cast %182 : i32 to index
      %184 = memref.load %arg2[%183] : memref<16xi32, #tpu.memory_space<smem>>
      %c0_i32_104 = arith.constant 0 : i32
      %185 = tpu.memref_slice %arg3[%184, %c0_i32_104] : memref<64x128xf32, #tpu.memory_space<any>> -> memref<1x128xf32, #tpu.memory_space<any>>
      %c9_i32_105 = arith.constant 9 : i32
      %c0_i32_106 = arith.constant 0 : i32
      %186 = tpu.memref_slice %arg5[%108, %c9_i32_105, %c0_i32_106] : memref<2x16x128xf32, #tpu.memory_space<vmem>> -> memref<1x1x128xf32, #tpu.memory_space<vmem>>
      %187 = tpu.memref_squeeze %186 : memref<1x1x128xf32, #tpu.memory_space<vmem>> -> memref<1x128xf32, #tpu.memory_space<vmem>>
      %188 = tpu.memref_slice %arg6[%108] : memref<2x!tpu.dma_semaphore, #tpu.memory_space<semaphore_mem>> -> memref<1x!tpu.dma_semaphore, #tpu.memory_space<semaphore_mem>>
      %189 = tpu.memref_squeeze %188 : memref<1x!tpu.dma_semaphore, #tpu.memory_space<semaphore_mem>> -> memref<!tpu.dma_semaphore, #tpu.memory_space<semaphore_mem>>
      tpu.enqueue_dma source(%185 : memref<1x128xf32, #tpu.memory_space<any>>) target(%187 : memref<1x128xf32, #tpu.memory_space<vmem>>) target_semaphore(%189 : memref<!tpu.dma_semaphore, #tpu.memory_space<semaphore_mem>>)
      %c10_i32_107 = arith.constant 10 : i32
      %190 = arith.addi %109, %c10_i32_107 : i32
      %191 = arith.index_cast %190 : i32 to index
      %192 = memref.load %arg2[%191] : memref<16xi32, #tpu.memory_space<smem>>
      %c0_i32_108 = arith.constant 0 : i32
      %193 = tpu.memref_slice %arg3[%192, %c0_i32_108] : memref<64x128xf32, #tpu.memory_space<any>> -> memref<1x128xf32, #tpu.memory_space<any>>
      %c10_i32_109 = arith.constant 10 : i32
      %c0_i32_110 = arith.constant 0 : i32
      %194 = tpu.memref_slice %arg5[%108, %c10_i32_109, %c0_i32_110] : memref<2x16x128xf32, #tpu.memory_space<vmem>> -> memref<1x1x128xf32, #tpu.memory_space<vmem>>
      %195 = tpu.memref_squeeze %194 : memref<1x1x128xf32, #tpu.memory_space<vmem>> -> memref<1x128xf32, #tpu.memory_space<vmem>>
      %196 = tpu.memref_slice %arg6[%108] : memref<2x!tpu.dma_semaphore, #tpu.memory_space<semaphore_mem>> -> memref<1x!tpu.dma_semaphore, #tpu.memory_space<semaphore_mem>>
      %197 = tpu.memref_squeeze %196 : memref<1x!tpu.dma_semaphore, #tpu.memory_space<semaphore_mem>> -> memref<!tpu.dma_semaphore, #tpu.memory_space<semaphore_mem>>
      tpu.enqueue_dma source(%193 : memref<1x128xf32, #tpu.memory_space<any>>) target(%195 : memref<1x128xf32, #tpu.memory_space<vmem>>) target_semaphore(%197 : memref<!tpu.dma_semaphore, #tpu.memory_space<semaphore_mem>>)
      %c11_i32_111 = arith.constant 11 : i32
      %198 = arith.addi %109, %c11_i32_111 : i32
      %199 = arith.index_cast %198 : i32 to index
      %200 = memref.load %arg2[%199] : memref<16xi32, #tpu.memory_space<smem>>
      %c0_i32_112 = arith.constant 0 : i32
      %201 = tpu.memref_slice %arg3[%200, %c0_i32_112] : memref<64x128xf32, #tpu.memory_space<any>> -> memref<1x128xf32, #tpu.memory_space<any>>
      %c11_i32_113 = arith.constant 11 : i32
      %c0_i32_114 = arith.constant 0 : i32
      %202 = tpu.memref_slice %arg5[%108, %c11_i32_113, %c0_i32_114] : memref<2x16x128xf32, #tpu.memory_space<vmem>> -> memref<1x1x128xf32, #tpu.memory_space<vmem>>
      %203 = tpu.memref_squeeze %202 : memref<1x1x128xf32, #tpu.memory_space<vmem>> -> memref<1x128xf32, #tpu.memory_space<vmem>>
      %204 = tpu.memref_slice %arg6[%108] : memref<2x!tpu.dma_semaphore, #tpu.memory_space<semaphore_mem>> -> memref<1x!tpu.dma_semaphore, #tpu.memory_space<semaphore_mem>>
      %205 = tpu.memref_squeeze %204 : memref<1x!tpu.dma_semaphore, #tpu.memory_space<semaphore_mem>> -> memref<!tpu.dma_semaphore, #tpu.memory_space<semaphore_mem>>
      tpu.enqueue_dma source(%201 : memref<1x128xf32, #tpu.memory_space<any>>) target(%203 : memref<1x128xf32, #tpu.memory_space<vmem>>) target_semaphore(%205 : memref<!tpu.dma_semaphore, #tpu.memory_space<semaphore_mem>>)
      %c12_i32_115 = arith.constant 12 : i32
      %206 = arith.addi %109, %c12_i32_115 : i32
      %207 = arith.index_cast %206 : i32 to index
      %208 = memref.load %arg2[%207] : memref<16xi32, #tpu.memory_space<smem>>
      %c0_i32_116 = arith.constant 0 : i32
      %209 = tpu.memref_slice %arg3[%208, %c0_i32_116] : memref<64x128xf32, #tpu.memory_space<any>> -> memref<1x128xf32, #tpu.memory_space<any>>
      %c12_i32_117 = arith.constant 12 : i32
      %c0_i32_118 = arith.constant 0 : i32
      %210 = tpu.memref_slice %arg5[%108, %c12_i32_117, %c0_i32_118] : memref<2x16x128xf32, #tpu.memory_space<vmem>> -> memref<1x1x128xf32, #tpu.memory_space<vmem>>
      %211 = tpu.memref_squeeze %210 : memref<1x1x128xf32, #tpu.memory_space<vmem>> -> memref<1x128xf32, #tpu.memory_space<vmem>>
      %212 = tpu.memref_slice %arg6[%108] : memref<2x!tpu.dma_semaphore, #tpu.memory_space<semaphore_mem>> -> memref<1x!tpu.dma_semaphore, #tpu.memory_space<semaphore_mem>>
      %213 = tpu.memref_squeeze %212 : memref<1x!tpu.dma_semaphore, #tpu.memory_space<semaphore_mem>> -> memref<!tpu.dma_semaphore, #tpu.memory_space<semaphore_mem>>
      tpu.enqueue_dma source(%209 : memref<1x128xf32, #tpu.memory_space<any>>) target(%211 : memref<1x128xf32, #tpu.memory_space<vmem>>) target_semaphore(%213 : memref<!tpu.dma_semaphore, #tpu.memory_space<semaphore_mem>>)
      %c13_i32_119 = arith.constant 13 : i32
      %214 = arith.addi %109, %c13_i32_119 : i32
      %215 = arith.index_cast %214 : i32 to index
      %216 = memref.load %arg2[%215] : memref<16xi32, #tpu.memory_space<smem>>
      %c0_i32_120 = arith.constant 0 : i32
      %217 = tpu.memref_slice %arg3[%216, %c0_i32_120] : memref<64x128xf32, #tpu.memory_space<any>> -> memref<1x128xf32, #tpu.memory_space<any>>
      %c13_i32_121 = arith.constant 13 : i32
      %c0_i32_122 = arith.constant 0 : i32
      %218 = tpu.memref_slice %arg5[%108, %c13_i32_121, %c0_i32_122] : memref<2x16x128xf32, #tpu.memory_space<vmem>> -> memref<1x1x128xf32, #tpu.memory_space<vmem>>
      %219 = tpu.memref_squeeze %218 : memref<1x1x128xf32, #tpu.memory_space<vmem>> -> memref<1x128xf32, #tpu.memory_space<vmem>>
      %220 = tpu.memref_slice %arg6[%108] : memref<2x!tpu.dma_semaphore, #tpu.memory_space<semaphore_mem>> -> memref<1x!tpu.dma_semaphore, #tpu.memory_space<semaphore_mem>>
      %221 = tpu.memref_squeeze %220 : memref<1x!tpu.dma_semaphore, #tpu.memory_space<semaphore_mem>> -> memref<!tpu.dma_semaphore, #tpu.memory_space<semaphore_mem>>
      tpu.enqueue_dma source(%217 : memref<1x128xf32, #tpu.memory_space<any>>) target(%219 : memref<1x128xf32, #tpu.memory_space<vmem>>) target_semaphore(%221 : memref<!tpu.dma_semaphore, #tpu.memory_space<semaphore_mem>>)
      %c14_i32_123 = arith.constant 14 : i32
      %222 = arith.addi %109, %c14_i32_123 : i32
      %223 = arith.index_cast %222 : i32 to index
      %224 = memref.load %arg2[%223] : memref<16xi32, #tpu.memory_space<smem>>
      %c0_i32_124 = arith.constant 0 : i32
      %225 = tpu.memref_slice %arg3[%224, %c0_i32_124] : memref<64x128xf32, #tpu.memory_space<any>> -> memref<1x128xf32, #tpu.memory_space<any>>
      %c14_i32_125 = arith.constant 14 : i32
      %c0_i32_126 = arith.constant 0 : i32
      %226 = tpu.memref_slice %arg5[%108, %c14_i32_125, %c0_i32_126] : memref<2x16x128xf32, #tpu.memory_space<vmem>> -> memref<1x1x128xf32, #tpu.memory_space<vmem>>
      %227 = tpu.memref_squeeze %226 : memref<1x1x128xf32, #tpu.memory_space<vmem>> -> memref<1x128xf32, #tpu.memory_space<vmem>>
      %228 = tpu.memref_slice %arg6[%108] : memref<2x!tpu.dma_semaphore, #tpu.memory_space<semaphore_mem>> -> memref<1x!tpu.dma_semaphore, #tpu.memory_space<semaphore_mem>>
      %229 = tpu.memref_squeeze %228 : memref<1x!tpu.dma_semaphore, #tpu.memory_space<semaphore_mem>> -> memref<!tpu.dma_semaphore, #tpu.memory_space<semaphore_mem>>
      tpu.enqueue_dma source(%225 : memref<1x128xf32, #tpu.memory_space<any>>) target(%227 : memref<1x128xf32, #tpu.memory_space<vmem>>) target_semaphore(%229 : memref<!tpu.dma_semaphore, #tpu.memory_space<semaphore_mem>>)
      %c15_i32_127 = arith.constant 15 : i32
      %230 = arith.addi %109, %c15_i32_127 : i32
      %231 = arith.index_cast %230 : i32 to index
      %232 = memref.load %arg2[%231] : memref<16xi32, #tpu.memory_space<smem>>
      %c0_i32_128 = arith.constant 0 : i32
      %233 = tpu.memref_slice %arg3[%232, %c0_i32_128] : memref<64x128xf32, #tpu.memory_space<any>> -> memref<1x128xf32, #tpu.memory_space<any>>
      %c15_i32_129 = arith.constant 15 : i32
      %c0_i32_130 = arith.constant 0 : i32
      %234 = tpu.memref_slice %arg5[%108, %c15_i32_129, %c0_i32_130] : memref<2x16x128xf32, #tpu.memory_space<vmem>> -> memref<1x1x128xf32, #tpu.memory_space<vmem>>
      %235 = tpu.memref_squeeze %234 : memref<1x1x128xf32, #tpu.memory_space<vmem>> -> memref<1x128xf32, #tpu.memory_space<vmem>>
      %236 = tpu.memref_slice %arg6[%108] : memref<2x!tpu.dma_semaphore, #tpu.memory_space<semaphore_mem>> -> memref<1x!tpu.dma_semaphore, #tpu.memory_space<semaphore_mem>>
      %237 = tpu.memref_squeeze %236 : memref<1x!tpu.dma_semaphore, #tpu.memory_space<semaphore_mem>> -> memref<!tpu.dma_semaphore, #tpu.memory_space<semaphore_mem>>
      tpu.enqueue_dma source(%233 : memref<1x128xf32, #tpu.memory_space<any>>) target(%235 : memref<1x128xf32, #tpu.memory_space<vmem>>) target_semaphore(%237 : memref<!tpu.dma_semaphore, #tpu.memory_space<semaphore_mem>>)
    } else {
    }
    %c0_i32_9 = arith.constant 0 : i32
    %c0_i32_10 = arith.constant 0 : i32
    %19 = tpu.memref_slice %arg3[%c0_i32_9, %c0_i32_10] : memref<64x128xf32, #tpu.memory_space<any>> -> memref<1x128xf32, #tpu.memory_space<any>>
    %c0_i32_11 = arith.constant 0 : i32
    %c0_i32_12 = arith.constant 0 : i32
    %20 = tpu.memref_slice %arg5[%11, %c0_i32_11, %c0_i32_12] : memref<2x16x128xf32, #tpu.memory_space<vmem>> -> memref<1x1x128xf32, #tpu.memory_space<vmem>>
    %21 = tpu.memref_squeeze %20 : memref<1x1x128xf32, #tpu.memory_space<vmem>> -> memref<1x128xf32, #tpu.memory_space<vmem>>
    %22 = tpu.memref_slice %arg6[%11] : memref<2x!tpu.dma_semaphore, #tpu.memory_space<semaphore_mem>> -> memref<1x!tpu.dma_semaphore, #tpu.memory_space<semaphore_mem>>
    %23 = tpu.memref_squeeze %22 : memref<1x!tpu.dma_semaphore, #tpu.memory_space<semaphore_mem>> -> memref<!tpu.dma_semaphore, #tpu.memory_space<semaphore_mem>>
    tpu.wait_dma2 semaphore(%23 : memref<!tpu.dma_semaphore, #tpu.memory_space<semaphore_mem>>) src(%19 : memref<1x128xf32, #tpu.memory_space<any>>) dst(%21 : memref<1x128xf32, #tpu.memory_space<vmem>>)
    %c0_i32_13 = arith.constant 0 : i32
    %c0_i32_14 = arith.constant 0 : i32
    %24 = tpu.memref_slice %arg3[%c0_i32_13, %c0_i32_14] : memref<64x128xf32, #tpu.memory_space<any>> -> memref<1x128xf32, #tpu.memory_space<any>>
    %c1_i32_15 = arith.constant 1 : i32
    %c0_i32_16 = arith.constant 0 : i32
    %25 = tpu.memref_slice %arg5[%11, %c1_i32_15, %c0_i32_16] : memref<2x16x128xf32, #tpu.memory_space<vmem>> -> memref<1x1x128xf32, #tpu.memory_space<vmem>>
    %26 = tpu.memref_squeeze %25 : memref<1x1x128xf32, #tpu.memory_space<vmem>> -> memref<1x128xf32, #tpu.memory_space<vmem>>
    %27 = tpu.memref_slice %arg6[%11] : memref<2x!tpu.dma_semaphore, #tpu.memory_space<semaphore_mem>> -> memref<1x!tpu.dma_semaphore, #tpu.memory_space<semaphore_mem>>
    %28 = tpu.memref_squeeze %27 : memref<1x!tpu.dma_semaphore, #tpu.memory_space<semaphore_mem>> -> memref<!tpu.dma_semaphore, #tpu.memory_space<semaphore_mem>>
    tpu.wait_dma2 semaphore(%28 : memref<!tpu.dma_semaphore, #tpu.memory_space<semaphore_mem>>) src(%24 : memref<1x128xf32, #tpu.memory_space<any>>) dst(%26 : memref<1x128xf32, #tpu.memory_space<vmem>>)
    %c0_i32_17 = arith.constant 0 : i32
    %c0_i32_18 = arith.constant 0 : i32
    %29 = tpu.memref_slice %arg3[%c0_i32_17, %c0_i32_18] : memref<64x128xf32, #tpu.memory_space<any>> -> memref<1x128xf32, #tpu.memory_space<any>>
    %c2_i32_19 = arith.constant 2 : i32
    %c0_i32_20 = arith.constant 0 : i32
    %30 = tpu.memref_slice %arg5[%11, %c2_i32_19, %c0_i32_20] : memref<2x16x128xf32, #tpu.memory_space<vmem>> -> memref<1x1x128xf32, #tpu.memory_space<vmem>>
    %31 = tpu.memref_squeeze %30 : memref<1x1x128xf32, #tpu.memory_space<vmem>> -> memref<1x128xf32, #tpu.memory_space<vmem>>
    %32 = tpu.memref_slice %arg6[%11] : memref<2x!tpu.dma_semaphore, #tpu.memory_space<semaphore_mem>> -> memref<1x!tpu.dma_semaphore, #tpu.memory_space<semaphore_mem>>
    %33 = tpu.memref_squeeze %32 : memref<1x!tpu.dma_semaphore, #tpu.memory_space<semaphore_mem>> -> memref<!tpu.dma_semaphore, #tpu.memory_space<semaphore_mem>>
    tpu.wait_dma2 semaphore(%33 : memref<!tpu.dma_semaphore, #tpu.memory_space<semaphore_mem>>) src(%29 : memref<1x128xf32, #tpu.memory_space<any>>) dst(%31 : memref<1x128xf32, #tpu.memory_space<vmem>>)
    %c0_i32_21 = arith.constant 0 : i32
    %c0_i32_22 = arith.constant 0 : i32
    %34 = tpu.memref_slice %arg3[%c0_i32_21, %c0_i32_22] : memref<64x128xf32, #tpu.memory_space<any>> -> memref<1x128xf32, #tpu.memory_space<any>>
    %c3_i32 = arith.constant 3 : i32
    %c0_i32_23 = arith.constant 0 : i32
    %35 = tpu.memref_slice %arg5[%11, %c3_i32, %c0_i32_23] : memref<2x16x128xf32, #tpu.memory_space<vmem>> -> memref<1x1x128xf32, #tpu.memory_space<vmem>>
    %36 = tpu.memref_squeeze %35 : memref<1x1x128xf32, #tpu.memory_space<vmem>> -> memref<1x128xf32, #tpu.memory_space<vmem>>
    %37 = tpu.memref_slice %arg6[%11] : memref<2x!tpu.dma_semaphore, #tpu.memory_space<semaphore_mem>> -> memref<1x!tpu.dma_semaphore, #tpu.memory_space<semaphore_mem>>
    %38 = tpu.memref_squeeze %37 : memref<1x!tpu.dma_semaphore, #tpu.memory_space<semaphore_mem>> -> memref<!tpu.dma_semaphore, #tpu.memory_space<semaphore_mem>>
    tpu.wait_dma2 semaphore(%38 : memref<!tpu.dma_semaphore, #tpu.memory_space<semaphore_mem>>) src(%34 : memref<1x128xf32, #tpu.memory_space<any>>) dst(%36 : memref<1x128xf32, #tpu.memory_space<vmem>>)
    %c0_i32_24 = arith.constant 0 : i32
    %c0_i32_25 = arith.constant 0 : i32
    %39 = tpu.memref_slice %arg3[%c0_i32_24, %c0_i32_25] : memref<64x128xf32, #tpu.memory_space<any>> -> memref<1x128xf32, #tpu.memory_space<any>>
    %c4_i32 = arith.constant 4 : i32
    %c0_i32_26 = arith.constant 0 : i32
    %40 = tpu.memref_slice %arg5[%11, %c4_i32, %c0_i32_26] : memref<2x16x128xf32, #tpu.memory_space<vmem>> -> memref<1x1x128xf32, #tpu.memory_space<vmem>>
    %41 = tpu.memref_squeeze %40 : memref<1x1x128xf32, #tpu.memory_space<vmem>> -> memref<1x128xf32, #tpu.memory_space<vmem>>
    %42 = tpu.memref_slice %arg6[%11] : memref<2x!tpu.dma_semaphore, #tpu.memory_space<semaphore_mem>> -> memref<1x!tpu.dma_semaphore, #tpu.memory_space<semaphore_mem>>
    %43 = tpu.memref_squeeze %42 : memref<1x!tpu.dma_semaphore, #tpu.memory_space<semaphore_mem>> -> memref<!tpu.dma_semaphore, #tpu.memory_space<semaphore_mem>>
    tpu.wait_dma2 semaphore(%43 : memref<!tpu.dma_semaphore, #tpu.memory_space<semaphore_mem>>) src(%39 : memref<1x128xf32, #tpu.memory_space<any>>) dst(%41 : memref<1x128xf32, #tpu.memory_space<vmem>>)
    %c0_i32_27 = arith.constant 0 : i32
    %c0_i32_28 = arith.constant 0 : i32
    %44 = tpu.memref_slice %arg3[%c0_i32_27, %c0_i32_28] : memref<64x128xf32, #tpu.memory_space<any>> -> memref<1x128xf32, #tpu.memory_space<any>>
    %c5_i32 = arith.constant 5 : i32
    %c0_i32_29 = arith.constant 0 : i32
    %45 = tpu.memref_slice %arg5[%11, %c5_i32, %c0_i32_29] : memref<2x16x128xf32, #tpu.memory_space<vmem>> -> memref<1x1x128xf32, #tpu.memory_space<vmem>>
    %46 = tpu.memref_squeeze %45 : memref<1x1x128xf32, #tpu.memory_space<vmem>> -> memref<1x128xf32, #tpu.memory_space<vmem>>
    %47 = tpu.memref_slice %arg6[%11] : memref<2x!tpu.dma_semaphore, #tpu.memory_space<semaphore_mem>> -> memref<1x!tpu.dma_semaphore, #tpu.memory_space<semaphore_mem>>
    %48 = tpu.memref_squeeze %47 : memref<1x!tpu.dma_semaphore, #tpu.memory_space<semaphore_mem>> -> memref<!tpu.dma_semaphore, #tpu.memory_space<semaphore_mem>>
    tpu.wait_dma2 semaphore(%48 : memref<!tpu.dma_semaphore, #tpu.memory_space<semaphore_mem>>) src(%44 : memref<1x128xf32, #tpu.memory_space<any>>) dst(%46 : memref<1x128xf32, #tpu.memory_space<vmem>>)
    %c0_i32_30 = arith.constant 0 : i32
    %c0_i32_31 = arith.constant 0 : i32
    %49 = tpu.memref_slice %arg3[%c0_i32_30, %c0_i32_31] : memref<64x128xf32, #tpu.memory_space<any>> -> memref<1x128xf32, #tpu.memory_space<any>>
    %c6_i32 = arith.constant 6 : i32
    %c0_i32_32 = arith.constant 0 : i32
    %50 = tpu.memref_slice %arg5[%11, %c6_i32, %c0_i32_32] : memref<2x16x128xf32, #tpu.memory_space<vmem>> -> memref<1x1x128xf32, #tpu.memory_space<vmem>>
    %51 = tpu.memref_squeeze %50 : memref<1x1x128xf32, #tpu.memory_space<vmem>> -> memref<1x128xf32, #tpu.memory_space<vmem>>
    %52 = tpu.memref_slice %arg6[%11] : memref<2x!tpu.dma_semaphore, #tpu.memory_space<semaphore_mem>> -> memref<1x!tpu.dma_semaphore, #tpu.memory_space<semaphore_mem>>
    %53 = tpu.memref_squeeze %52 : memref<1x!tpu.dma_semaphore, #tpu.memory_space<semaphore_mem>> -> memref<!tpu.dma_semaphore, #tpu.memory_space<semaphore_mem>>
    tpu.wait_dma2 semaphore(%53 : memref<!tpu.dma_semaphore, #tpu.memory_space<semaphore_mem>>) src(%49 : memref<1x128xf32, #tpu.memory_space<any>>) dst(%51 : memref<1x128xf32, #tpu.memory_space<vmem>>)
    %c0_i32_33 = arith.constant 0 : i32
    %c0_i32_34 = arith.constant 0 : i32
    %54 = tpu.memref_slice %arg3[%c0_i32_33, %c0_i32_34] : memref<64x128xf32, #tpu.memory_space<any>> -> memref<1x128xf32, #tpu.memory_space<any>>
    %c7_i32 = arith.constant 7 : i32
    %c0_i32_35 = arith.constant 0 : i32
    %55 = tpu.memref_slice %arg5[%11, %c7_i32, %c0_i32_35] : memref<2x16x128xf32, #tpu.memory_space<vmem>> -> memref<1x1x128xf32, #tpu.memory_space<vmem>>
    %56 = tpu.memref_squeeze %55 : memref<1x1x128xf32, #tpu.memory_space<vmem>> -> memref<1x128xf32, #tpu.memory_space<vmem>>
    %57 = tpu.memref_slice %arg6[%11] : memref<2x!tpu.dma_semaphore, #tpu.memory_space<semaphore_mem>> -> memref<1x!tpu.dma_semaphore, #tpu.memory_space<semaphore_mem>>
    %58 = tpu.memref_squeeze %57 : memref<1x!tpu.dma_semaphore, #tpu.memory_space<semaphore_mem>> -> memref<!tpu.dma_semaphore, #tpu.memory_space<semaphore_mem>>
    tpu.wait_dma2 semaphore(%58 : memref<!tpu.dma_semaphore, #tpu.memory_space<semaphore_mem>>) src(%54 : memref<1x128xf32, #tpu.memory_space<any>>) dst(%56 : memref<1x128xf32, #tpu.memory_space<vmem>>)
    %c0_i32_36 = arith.constant 0 : i32
    %c0_i32_37 = arith.constant 0 : i32
    %59 = tpu.memref_slice %arg3[%c0_i32_36, %c0_i32_37] : memref<64x128xf32, #tpu.memory_space<any>> -> memref<1x128xf32, #tpu.memory_space<any>>
    %c8_i32 = arith.constant 8 : i32
    %c0_i32_38 = arith.constant 0 : i32
    %60 = tpu.memref_slice %arg5[%11, %c8_i32, %c0_i32_38] : memref<2x16x128xf32, #tpu.memory_space<vmem>> -> memref<1x1x128xf32, #tpu.memory_space<vmem>>
    %61 = tpu.memref_squeeze %60 : memref<1x1x128xf32, #tpu.memory_space<vmem>> -> memref<1x128xf32, #tpu.memory_space<vmem>>
    %62 = tpu.memref_slice %arg6[%11] : memref<2x!tpu.dma_semaphore, #tpu.memory_space<semaphore_mem>> -> memref<1x!tpu.dma_semaphore, #tpu.memory_space<semaphore_mem>>
    %63 = tpu.memref_squeeze %62 : memref<1x!tpu.dma_semaphore, #tpu.memory_space<semaphore_mem>> -> memref<!tpu.dma_semaphore, #tpu.memory_space<semaphore_mem>>
    tpu.wait_dma2 semaphore(%63 : memref<!tpu.dma_semaphore, #tpu.memory_space<semaphore_mem>>) src(%59 : memref<1x128xf32, #tpu.memory_space<any>>) dst(%61 : memref<1x128xf32, #tpu.memory_space<vmem>>)
    %c0_i32_39 = arith.constant 0 : i32
    %c0_i32_40 = arith.constant 0 : i32
    %64 = tpu.memref_slice %arg3[%c0_i32_39, %c0_i32_40] : memref<64x128xf32, #tpu.memory_space<any>> -> memref<1x128xf32, #tpu.memory_space<any>>
    %c9_i32 = arith.constant 9 : i32
    %c0_i32_41 = arith.constant 0 : i32
    %65 = tpu.memref_slice %arg5[%11, %c9_i32, %c0_i32_41] : memref<2x16x128xf32, #tpu.memory_space<vmem>> -> memref<1x1x128xf32, #tpu.memory_space<vmem>>
    %66 = tpu.memref_squeeze %65 : memref<1x1x128xf32, #tpu.memory_space<vmem>> -> memref<1x128xf32, #tpu.memory_space<vmem>>
    %67 = tpu.memref_slice %arg6[%11] : memref<2x!tpu.dma_semaphore, #tpu.memory_space<semaphore_mem>> -> memref<1x!tpu.dma_semaphore, #tpu.memory_space<semaphore_mem>>
    %68 = tpu.memref_squeeze %67 : memref<1x!tpu.dma_semaphore, #tpu.memory_space<semaphore_mem>> -> memref<!tpu.dma_semaphore, #tpu.memory_space<semaphore_mem>>
    tpu.wait_dma2 semaphore(%68 : memref<!tpu.dma_semaphore, #tpu.memory_space<semaphore_mem>>) src(%64 : memref<1x128xf32, #tpu.memory_space<any>>) dst(%66 : memref<1x128xf32, #tpu.memory_space<vmem>>)
    %c0_i32_42 = arith.constant 0 : i32
    %c0_i32_43 = arith.constant 0 : i32
    %69 = tpu.memref_slice %arg3[%c0_i32_42, %c0_i32_43] : memref<64x128xf32, #tpu.memory_space<any>> -> memref<1x128xf32, #tpu.memory_space<any>>
    %c10_i32 = arith.constant 10 : i32
    %c0_i32_44 = arith.constant 0 : i32
    %70 = tpu.memref_slice %arg5[%11, %c10_i32, %c0_i32_44] : memref<2x16x128xf32, #tpu.memory_space<vmem>> -> memref<1x1x128xf32, #tpu.memory_space<vmem>>
    %71 = tpu.memref_squeeze %70 : memref<1x1x128xf32, #tpu.memory_space<vmem>> -> memref<1x128xf32, #tpu.memory_space<vmem>>
    %72 = tpu.memref_slice %arg6[%11] : memref<2x!tpu.dma_semaphore, #tpu.memory_space<semaphore_mem>> -> memref<1x!tpu.dma_semaphore, #tpu.memory_space<semaphore_mem>>
    %73 = tpu.memref_squeeze %72 : memref<1x!tpu.dma_semaphore, #tpu.memory_space<semaphore_mem>> -> memref<!tpu.dma_semaphore, #tpu.memory_space<semaphore_mem>>
    tpu.wait_dma2 semaphore(%73 : memref<!tpu.dma_semaphore, #tpu.memory_space<semaphore_mem>>) src(%69 : memref<1x128xf32, #tpu.memory_space<any>>) dst(%71 : memref<1x128xf32, #tpu.memory_space<vmem>>)
    %c0_i32_45 = arith.constant 0 : i32
    %c0_i32_46 = arith.constant 0 : i32
    %74 = tpu.memref_slice %arg3[%c0_i32_45, %c0_i32_46] : memref<64x128xf32, #tpu.memory_space<any>> -> memref<1x128xf32, #tpu.memory_space<any>>
    %c11_i32 = arith.constant 11 : i32
    %c0_i32_47 = arith.constant 0 : i32
    %75 = tpu.memref_slice %arg5[%11, %c11_i32, %c0_i32_47] : memref<2x16x128xf32, #tpu.memory_space<vmem>> -> memref<1x1x128xf32, #tpu.memory_space<vmem>>
    %76 = tpu.memref_squeeze %75 : memref<1x1x128xf32, #tpu.memory_space<vmem>> -> memref<1x128xf32, #tpu.memory_space<vmem>>
    %77 = tpu.memref_slice %arg6[%11] : memref<2x!tpu.dma_semaphore, #tpu.memory_space<semaphore_mem>> -> memref<1x!tpu.dma_semaphore, #tpu.memory_space<semaphore_mem>>
    %78 = tpu.memref_squeeze %77 : memref<1x!tpu.dma_semaphore, #tpu.memory_space<semaphore_mem>> -> memref<!tpu.dma_semaphore, #tpu.memory_space<semaphore_mem>>
    tpu.wait_dma2 semaphore(%78 : memref<!tpu.dma_semaphore, #tpu.memory_space<semaphore_mem>>) src(%74 : memref<1x128xf32, #tpu.memory_space<any>>) dst(%76 : memref<1x128xf32, #tpu.memory_space<vmem>>)
    %c0_i32_48 = arith.constant 0 : i32
    %c0_i32_49 = arith.constant 0 : i32
    %79 = tpu.memref_slice %arg3[%c0_i32_48, %c0_i32_49] : memref<64x128xf32, #tpu.memory_space<any>> -> memref<1x128xf32, #tpu.memory_space<any>>
    %c12_i32 = arith.constant 12 : i32
    %c0_i32_50 = arith.constant 0 : i32
    %80 = tpu.memref_slice %arg5[%11, %c12_i32, %c0_i32_50] : memref<2x16x128xf32, #tpu.memory_space<vmem>> -> memref<1x1x128xf32, #tpu.memory_space<vmem>>
    %81 = tpu.memref_squeeze %80 : memref<1x1x128xf32, #tpu.memory_space<vmem>> -> memref<1x128xf32, #tpu.memory_space<vmem>>
    %82 = tpu.memref_slice %arg6[%11] : memref<2x!tpu.dma_semaphore, #tpu.memory_space<semaphore_mem>> -> memref<1x!tpu.dma_semaphore, #tpu.memory_space<semaphore_mem>>
    %83 = tpu.memref_squeeze %82 : memref<1x!tpu.dma_semaphore, #tpu.memory_space<semaphore_mem>> -> memref<!tpu.dma_semaphore, #tpu.memory_space<semaphore_mem>>
    tpu.wait_dma2 semaphore(%83 : memref<!tpu.dma_semaphore, #tpu.memory_space<semaphore_mem>>) src(%79 : memref<1x128xf32, #tpu.memory_space<any>>) dst(%81 : memref<1x128xf32, #tpu.memory_space<vmem>>)
    %c0_i32_51 = arith.constant 0 : i32
    %c0_i32_52 = arith.constant 0 : i32
    %84 = tpu.memref_slice %arg3[%c0_i32_51, %c0_i32_52] : memref<64x128xf32, #tpu.memory_space<any>> -> memref<1x128xf32, #tpu.memory_space<any>>
    %c13_i32 = arith.constant 13 : i32
    %c0_i32_53 = arith.constant 0 : i32
    %85 = tpu.memref_slice %arg5[%11, %c13_i32, %c0_i32_53] : memref<2x16x128xf32, #tpu.memory_space<vmem>> -> memref<1x1x128xf32, #tpu.memory_space<vmem>>
    %86 = tpu.memref_squeeze %85 : memref<1x1x128xf32, #tpu.memory_space<vmem>> -> memref<1x128xf32, #tpu.memory_space<vmem>>
    %87 = tpu.memref_slice %arg6[%11] : memref<2x!tpu.dma_semaphore, #tpu.memory_space<semaphore_mem>> -> memref<1x!tpu.dma_semaphore, #tpu.memory_space<semaphore_mem>>
    %88 = tpu.memref_squeeze %87 : memref<1x!tpu.dma_semaphore, #tpu.memory_space<semaphore_mem>> -> memref<!tpu.dma_semaphore, #tpu.memory_space<semaphore_mem>>
    tpu.wait_dma2 semaphore(%88 : memref<!tpu.dma_semaphore, #tpu.memory_space<semaphore_mem>>) src(%84 : memref<1x128xf32, #tpu.memory_space<any>>) dst(%86 : memref<1x128xf32, #tpu.memory_space<vmem>>)
    %c0_i32_54 = arith.constant 0 : i32
    %c0_i32_55 = arith.constant 0 : i32
    %89 = tpu.memref_slice %arg3[%c0_i32_54, %c0_i32_55] : memref<64x128xf32, #tpu.memory_space<any>> -> memref<1x128xf32, #tpu.memory_space<any>>
    %c14_i32 = arith.constant 14 : i32
    %c0_i32_56 = arith.constant 0 : i32
    %90 = tpu.memref_slice %arg5[%11, %c14_i32, %c0_i32_56] : memref<2x16x128xf32, #tpu.memory_space<vmem>> -> memref<1x1x128xf32, #tpu.memory_space<vmem>>
    %91 = tpu.memref_squeeze %90 : memref<1x1x128xf32, #tpu.memory_space<vmem>> -> memref<1x128xf32, #tpu.memory_space<vmem>>
    %92 = tpu.memref_slice %arg6[%11] : memref<2x!tpu.dma_semaphore, #tpu.memory_space<semaphore_mem>> -> memref<1x!tpu.dma_semaphore, #tpu.memory_space<semaphore_mem>>
    %93 = tpu.memref_squeeze %92 : memref<1x!tpu.dma_semaphore, #tpu.memory_space<semaphore_mem>> -> memref<!tpu.dma_semaphore, #tpu.memory_space<semaphore_mem>>
    tpu.wait_dma2 semaphore(%93 : memref<!tpu.dma_semaphore, #tpu.memory_space<semaphore_mem>>) src(%89 : memref<1x128xf32, #tpu.memory_space<any>>) dst(%91 : memref<1x128xf32, #tpu.memory_space<vmem>>)
    %c0_i32_57 = arith.constant 0 : i32
    %c0_i32_58 = arith.constant 0 : i32
    %94 = tpu.memref_slice %arg3[%c0_i32_57, %c0_i32_58] : memref<64x128xf32, #tpu.memory_space<any>> -> memref<1x128xf32, #tpu.memory_space<any>>
    %c15_i32 = arith.constant 15 : i32
    %c0_i32_59 = arith.constant 0 : i32
    %95 = tpu.memref_slice %arg5[%11, %c15_i32, %c0_i32_59] : memref<2x16x128xf32, #tpu.memory_space<vmem>> -> memref<1x1x128xf32, #tpu.memory_space<vmem>>
    %96 = tpu.memref_squeeze %95 : memref<1x1x128xf32, #tpu.memory_space<vmem>> -> memref<1x128xf32, #tpu.memory_space<vmem>>
    %97 = tpu.memref_slice %arg6[%11] : memref<2x!tpu.dma_semaphore, #tpu.memory_space<semaphore_mem>> -> memref<1x!tpu.dma_semaphore, #tpu.memory_space<semaphore_mem>>
    %98 = tpu.memref_squeeze %97 : memref<1x!tpu.dma_semaphore, #tpu.memory_space<semaphore_mem>> -> memref<!tpu.dma_semaphore, #tpu.memory_space<semaphore_mem>>
    tpu.wait_dma2 semaphore(%98 : memref<!tpu.dma_semaphore, #tpu.memory_space<semaphore_mem>>) src(%94 : memref<1x128xf32, #tpu.memory_space<any>>) dst(%96 : memref<1x128xf32, #tpu.memory_space<vmem>>)
    %99 = arith.index_cast %11 : i32 to index
    %c0 = arith.constant 0 : index
    %c0_60 = arith.constant 0 : index
    %100 = vector.load %arg5[%99, %c0, %c0_60] : memref<2x16x128xf32, #tpu.memory_space<vmem>>, vector<1x16x128xf32>
    %101 = vector.shape_cast %100 : vector<1x16x128xf32> to vector<16x128xf32>
    %cst = arith.constant 11.3137083 : f32
    %102 = vector.broadcast %cst : f32 to vector<16x128xf32>
    %103 = arith.mulf %101, %102 : vector<16x128xf32>
    %c0_61 = arith.constant 0 : index
    %c0_62 = arith.constant 0 : index
    %c0_63 = arith.constant 0 : index
    %c0_64 = arith.constant 0 : index
    %104 = vector.load %arg4[%c0_61, %c0_62, %c0_63, %c0_64] : memref<1x1x16x128xf32, #tpu.memory_space<vmem>>, vector<1x1x16x128xf32>
    %105 = vector.shape_cast %104 : vector<1x1x16x128xf32> to vector<16x128xf32>
    %106 = vector.shape_cast %103 : vector<16x128xf32> to vector<1x1x16x128xf32>
    tpu.vector_store %arg4[%c0_61, %c0_62, %c0_63, %c0_64], %106 {strides = array<i32>} : memref<1x1x16x128xf32, #tpu.memory_space<vmem>>, vector<1x1x16x128xf32>,
    return
  }
  func.func @transform_1(%arg0: i32, %arg1: i32, %arg2: memref<16xi32, #tpu.memory_space<smem>>) -> (i32, i32, i32, i32) {
    %c0_i32 = arith.constant 0 : i32
    %c0_i32_0 = arith.constant 0 : i32
    %c0_i32_1 = arith.constant 0 : i32
    return %arg0, %arg1, %c0_i32, %c0_i32_0 : i32, i32, i32, i32
  }
}

</mosaic_0001>

<bundles_post_ra>
// kernel: tpu_custom_call.1
= control target key start
LH: loop header
LB: loop body
LE: loop exit
PB: predicated region body
PF: predicated region fallthrough
CT: control target
= control target key end

     0   :  { %s1575_s0 = inlined_call_operand.hbm [shape: s32[16], index: 0, kind: input, shape index: {}]   ;;  %s1576_s1 = inlined_call_operand.hbm [shape: f32[64,128], index: 1, kind: input, shape index: {}]   ;;  %s1577_s2 = inlined_call_operand.hbm [shape: f32[1,1,16,128], index: 2, kind: output, shape index: {}]  }
   0x1   :  { %s831_s11 = scalar_lea.hbm %s1575_s0, 16 }
   0x2   :  { %p832_p0 = scmp.ne.s32.totalorder %s1575_s0, %s831_s11  ;;  %p835_p1 = scmp.lt.u32.totalorder %s831_s11, %s1575_s0 }
   0x4   :  { %p837_p2 = pnand %p835_p1, %p832_p0 }
   0x6   :  { %840 = shalt.err (!%p837_p2)  }
   0x7   :  { %s1253_s16 = smov [#allocation5]  }
   0x8   :  { %8 = dma.hbm_to_smem %s1575_s0, 16, %s1253_s16, [#allocation4] }
   0x9   :  { %1247 = dma.done.wait [#allocation4], 16 }
   0xa   :  { %1248 = vsyncadd [#allocation4], 4294967280 }
   0xb   :  { %10 = sfence }
   0xc   :  { %11 = vsyncpa [#allocation7], 0  ;;  %s26_s19 = sld [smem:[#allocation5]]  ;;  %s1254_s20 = smov [#allocation2]  }
   0xd   :  { %s36_s21 = sshll.u32 %s1254_s20, 4  ;;  %s1300_s22 = sld [smem:[#allocation5 + $0x1]]  ;;  %s1302_s21 = int_to_ptr.vmem [resolvable:$true] %s36_s21 }
   0xe   :  { %s1255_s23 = smov [#allocation2 + $0x1]   ;;  %s1304_s25 = sld [smem:[#allocation5 + $0x2]] }
   0xf   :  { %s52_s24 = sshll.u32 %s1255_s23, 4  ;;  %s1256_s26 = smov [#allocation2 + $0x2]   ;;  %s1306_s24 = int_to_ptr.vmem [resolvable:$true] %s52_s24 }
  0x10   :  { %s68_s0 = sshll.u32 %s1256_s26, 4  ;;  %s1308_s27 = sld [smem:[#allocation5 + $0x3]]  ;;  %s1310_s0 = int_to_ptr.vmem [resolvable:$true] %s68_s0 }
  0x11   :  { %s1319_s8 = scalar_lea.hbm %s1576_s1, 1024 }
  0x12   :  { %s746_s28 = sshll.u32 %s26_s19, 4 }
  0x13   :  { %s28_s3 = scalar_lea.hbm %s1576_s1, %s746_s28  ;;  %s748_s4 = sshll.u32 %s1300_s22, 4 }
  0x14   :  { %s841_s5 = scalar_lea.hbm %s28_s3, 16  ;;  %p844_p4 = scmp.lt.u32.totalorder %s28_s3, %s1576_s1 }
  0x15   :  { %p842_p3 = scmp.ne.s32.totalorder %s28_s3, %s841_s5  ;;  %p845_p5 = scmp.lt.u32.totalorder %s1319_s8, %s841_s5 }
  0x16   :  { %p847_p7 = scmp.lt.u32.totalorder %s841_s5, %s28_s3 }
  0x17   :  { %p846_p6 = por %p845_p5, %p844_p4 }
  0x19   :  { %p848_p8 = por %p847_p7, %p846_p6 }
  0x1b   :  { %p849_p9 = pnand %p848_p8, %p842_p3 }
  0x1d   :  { %852 = shalt.err (!%p849_p9)  }
  0x1e   :  { %s853_s11 = scalar_lea.vmem %s1302_s21, 16  ;;  %s1328_s12 = scalar_lea.vmem %s1302_s21, 512 }
  0x1f   :  { %p854_p10 = scmp.ne.s32.totalorder %s1302_s21, %s853_s11  ;;  %p858_p11 = scmp.lt.s32.totalorder %s1302_s21, %s1302_s21 }
  0x20   :  { %p859_p12 = scmp.lt.s32.totalorder %s1328_s12, %s853_s11 }
  0x22   :  { %p860_p13 = por %p859_p12, %p858_p11 }
  0x24   :  { %p861_p0 = pnand %p860_p13, %p854_p10 }
  0x26   :  { %864 = shalt.err (!%p861_p0)  }
  0x27   :  { %39 = dma.hbm_to_vmem [thread:$0]  %s28_s3, 16, %s1302_s21, [#allocation3] }
  0x28   :  { %s43_s15 = scalar_lea.hbm %s1576_s1, %s748_s4  ;;  %s750_s16 = sshll.u32 %s1304_s25, 4 }
  0x29   :  { %s865_s17 = scalar_lea.hbm %s43_s15, 16  ;;  %p868_p2 = scmp.lt.u32.totalorder %s43_s15, %s1576_s1 }
  0x2a   :  { %p866_p1 = scmp.ne.s32.totalorder %s43_s15, %s865_s17  ;;  %p869_p3 = scmp.lt.u32.totalorder %s1319_s8, %s865_s17 }
  0x2b   :  { %p871_p5 = scmp.lt.u32.totalorder %s865_s17, %s43_s15 }
  0x2c   :  { %p870_p4 = por %p869_p3, %p868_p2 }
  0x2e   :  { %p872_p6 = por %p871_p5, %p870_p4 }
  0x30   :  { %p873_p7 = pnand %p872_p6, %p866_p1 }
  0x32   :  { %876 = shalt.err (!%p873_p7)  }
  0x33   :  { %s877_s20 = scalar_lea.vmem %s1306_s24, 16  ;;  %p882_p9 = scmp.lt.s32.totalorder %s1306_s24, %s1302_s21 }
  0x34   :  { %p878_p8 = scmp.ne.s32.totalorder %s1306_s24, %s877_s20  ;;  %p883_p10 = scmp.lt.s32.totalorder %s1328_s12, %s877_s20 }
  0x36   :  { %p884_p11 = por %p883_p10, %p882_p9 }
  0x38   :  { %p885_p12 = pnand %p884_p11, %p878_p8 }
  0x3a   :  { %888 = shalt.err (!%p885_p12)  }
  0x3b   :  { %55 = dma.hbm_to_vmem [thread:$0]  %s43_s15, 16, %s1306_s24, [#allocation3] }
  0x3c   :  { %s59_s25 = scalar_lea.hbm %s1576_s1, %s750_s16  ;;  %s752_s26 = sshll.u32 %s1308_s27, 4 }
  0x3d   :  { %s889_s28 = scalar_lea.hbm %s59_s25, 16  ;;  %p892_p0 = scmp.lt.u32.totalorder %s59_s25, %s1576_s1 }
  0x3e   :  { %p890_p13 = scmp.ne.s32.totalorder %s59_s25, %s889_s28  ;;  %p893_p1 = scmp.lt.u32.totalorder %s1319_s8, %s889_s28 }
  0x3f   :  { %p895_p3 = scmp.lt.u32.totalorder %s889_s28, %s59_s25 }
  0x40   :  { %p894_p2 = por %p893_p1, %p892_p0 }
  0x42   :  { %p896_p4 = por %p895_p3, %p894_p2 }
  0x44   :  { %p897_p5 = pnand %p896_p4, %p890_p13 }
  0x46   :  { %900 = shalt.err (!%p897_p5)  }
  0x47   :  { %s901_s24 = scalar_lea.vmem %s1310_s0, 16  ;;  %p906_p7 = scmp.lt.s32.totalorder %s1310_s0, %s1302_s21 }
  0x48   :  { %p902_p6 = scmp.ne.s32.totalorder %s1310_s0, %s901_s24  ;;  %p907_p8 = scmp.lt.s32.totalorder %s1328_s12, %s901_s24 }
  0x4a   :  { %p908_p9 = por %p907_p8, %p906_p7 }
  0x4c   :  { %p909_p10 = pnand %p908_p9, %p902_p6 }
  0x4e   :  { %912 = shalt.err (!%p909_p10)  }
  0x4f   :  { %71 = dma.hbm_to_vmem [thread:$0]  %s59_s25, 16, %s1310_s0, [#allocation3] }
  0x50   :  { %s75_s4 = scalar_lea.hbm %s1576_s1, %s752_s26  ;;  %s1257_s5 = smov [#allocation2 + $0x3]  }
  0x51   :  { %s84_s6 = sshll.u32 %s1257_s5, 4  ;;  %s1365_s7 = sld [smem:[#allocation5 + $0x4]]  ;;  %s85_s6 = int_to_ptr.vmem [resolvable:$true] %s84_s6 }
  0x52   :  { %s913_s9 = scalar_lea.hbm %s75_s4, 16  ;;  %p916_p12 = scmp.lt.u32.totalorder %s75_s4, %s1576_s1 }
  0x53   :  { %p914_p11 = scmp.ne.s32.totalorder %s75_s4, %s913_s9  ;;  %p917_p13 = scmp.lt.u32.totalorder %s1319_s8, %s913_s9 }
  0x54   :  { %p919_p1 = scmp.lt.u32.totalorder %s913_s9, %s75_s4 }
  0x55   :  { %p918_p0 = por %p917_p13, %p916_p12 }
  0x57   :  { %p920_p2 = por %p919_p1, %p918_p0 }
  0x59   :  { %p921_p3 = pnand %p920_p2, %p914_p11 }
  0x5b   :  { %924 = shalt.err (!%p921_p3)  }
  0x5c   :  { %s925_s0 = scalar_lea.vmem %s85_s6, 16  ;;  %p930_p5 = scmp.lt.s32.totalorder %s85_s6, %s1302_s21 }
  0x5d   :  { %p926_p4 = scmp.ne.s32.totalorder %s85_s6, %s925_s0  ;;  %p931_p6 = scmp.lt.s32.totalorder %s1328_s12, %s925_s0 }
  0x5f   :  { %p932_p7 = por %p931_p6, %p930_p5 }
  0x61   :  { %p933_p8 = pnand %p932_p7, %p926_p4 }
  0x63   :  { %936 = shalt.err (!%p933_p8)  }
  0x64   :  { %87 = dma.hbm_to_vmem [thread:$0]  %s75_s4, 16, %s85_s6, [#allocation3] }
  0x65   :  { %s1258_s13 = smov [#allocation2 + $0x4]   ;;  %s1373_s15 = sld [smem:[#allocation5 + $0x5]] }
  0x66   :  { %s100_s14 = sshll.u32 %s1258_s13, 4  ;;  %s1259_s16 = smov [#allocation2 + $0x5]   ;;  %s101_s14 = int_to_ptr.vmem [resolvable:$true] %s100_s14 }
  0x67   :  { %s116_s17 = sshll.u32 %s1259_s16, 4  ;;  %s1375_s18 = sld [smem:[#allocation5 + $0x6]]  ;;  %s1378_s17 = int_to_ptr.vmem [resolvable:$true] %s116_s17 }
  0x68   :  { %s754_s19 = sshll.u32 %s1365_s7, 4 }
  0x69   :  { %s91_s23 = scalar_lea.hbm %s1576_s1, %s754_s19 }
  0x6a   :  { %s937_s25 = scalar_lea.hbm %s91_s23, 16  ;;  %p940_p10 = scmp.lt.u32.totalorder %s91_s23, %s1576_s1 }
  0x6b   :  { %p938_p9 = scmp.ne.s32.totalorder %s91_s23, %s937_s25  ;;  %p941_p11 = scmp.lt.u32.totalorder %s1319_s8, %s937_s25 }
  0x6c   :  { %p943_p13 = scmp.lt.u32.totalorder %s937_s25, %s91_s23 }
  0x6d   :  { %p942_p12 = por %p941_p11, %p940_p10 }
  0x6f   :  { %p944_p0 = por %p943_p13, %p942_p12 }
  0x71   :  { %p945_p1 = pnand %p944_p0, %p938_p9 }
  0x73   :  { %948 = shalt.err (!%p945_p1)  }
  0x74   :  { %s949_s29 = scalar_lea.vmem %s101_s14, 16  ;;  %p954_p3 = scmp.lt.s32.totalorder %s101_s14, %s1302_s21 }
  0x75   :  { %p950_p2 = scmp.ne.s32.totalorder %s101_s14, %s949_s29  ;;  %p955_p4 = scmp.lt.s32.totalorder %s1328_s12, %s949_s29 }
  0x77   :  { %p956_p5 = por %p955_p4, %p954_p3 }
  0x79   :  { %p957_p6 = pnand %p956_p5, %p950_p2 }
  0x7b   :  { %960 = shalt.err (!%p957_p6)  }
  0x7c   :  { %103 = dma.hbm_to_vmem [thread:$0]  %s91_s23, 16, %s101_s14, [#allocation3] }
  0x7d   :  { %s756_s30 = sshll.u32 %s1373_s15, 4  ;;  %s1260_s24 = smov [#allocation2 + $0x6]  }
  0x7e   :  { %s132_s27 = sshll.u32 %s1260_s24, 4  ;;  %s107_s5 = scalar_lea.hbm %s1576_s1, %s756_s30  ;;  %s1393_s27 = int_to_ptr.vmem [resolvable:$true] %s132_s27 }
  0x7f   :  { %s961_s6 = scalar_lea.hbm %s107_s5, 16  ;;  %p964_p8 = scmp.lt.u32.totalorder %s107_s5, %s1576_s1 }
  0x80   :  { %p962_p7 = scmp.ne.s32.totalorder %s107_s5, %s961_s6  ;;  %p965_p9 = scmp.lt.u32.totalorder %s1319_s8, %s961_s6 }
  0x81   :  { %p967_p11 = scmp.lt.u32.totalorder %s961_s6, %s107_s5 }
  0x82   :  { %p966_p10 = por %p965_p9, %p964_p8 }
  0x84   :  { %p968_p12 = por %p967_p11, %p966_p10 }
  0x86   :  { %p969_p13 = pnand %p968_p12, %p962_p7 }
  0x88   :  { %972 = shalt.err (!%p969_p13)  }
  0x89   :  { %s973_s10 = scalar_lea.vmem %s1378_s17, 16  ;;  %p978_p1 = scmp.lt.s32.totalorder %s1378_s17, %s1302_s21 }
  0x8a   :  { %p974_p0 = scmp.ne.s32.totalorder %s1378_s17, %s973_s10  ;;  %p979_p2 = scmp.lt.s32.totalorder %s1328_s12, %s973_s10 }
  0x8c   :  { %p980_p3 = por %p979_p2, %p978_p1 }
  0x8e   :  { %p981_p4 = pnand %p980_p3, %p974_p0 }
  0x90   :  { %984 = shalt.err (!%p981_p4)  }
  0x91   :  { %119 = dma.hbm_to_vmem [thread:$0]  %s107_s5, 16, %s1378_s17, [#allocation3] }
  0x92   :  { %s758_s11 = sshll.u32 %s1375_s18, 4  ;;  %s1406_s0 = sld [smem:[#allocation5 + $0x7]] }
  0x93   :  { %s123_s15 = scalar_lea.hbm %s1576_s1, %s758_s11 }
  0x94   :  { %s985_s16 = scalar_lea.hbm %s123_s15, 16  ;;  %p988_p6 = scmp.lt.u32.totalorder %s123_s15, %s1576_s1 }
  0x95   :  { %p986_p5 = scmp.ne.s32.totalorder %s123_s15, %s985_s16  ;;  %p989_p7 = scmp.lt.u32.totalorder %s1319_s8, %s985_s16 }
  0x96   :  { %p991_p9 = scmp.lt.u32.totalorder %s985_s16, %s123_s15 }
  0x97   :  { %p990_p8 = por %p989_p7, %p988_p6 }
  0x99   :  { %p992_p10 = por %p991_p9, %p990_p8 }
  0x9b   :  { %p993_p11 = pnand %p992_p10, %p986_p5 }
  0x9d   :  { %996 = shalt.err (!%p993_p11)  }
  0x9e   :  { %s997_s17 = scalar_lea.vmem %s1393_s27, 16  ;;  %p1002_p13 = scmp.lt.s32.totalorder %s1393_s27, %s1302_s21 }
  0x9f   :  { %p998_p12 = scmp.ne.s32.totalorder %s1393_s27, %s997_s17  ;;  %p1003_p0 = scmp.lt.s32.totalorder %s1328_s12, %s997_s17 }
  0xa1   :  { %p1004_p1 = por %p1003_p0, %p1002_p13 }
  0xa3   :  { %p1005_p2 = pnand %p1004_p1, %p998_p12 }
  0xa5   :  { %1008 = shalt.err (!%p1005_p2)  }
  0xa6   :  { %135 = dma.hbm_to_vmem [thread:$0]  %s123_s15, 16, %s1393_s27, [#allocation3] }
  0xa7   :  { %s1261_s18 = smov [#allocation2 + $0x7]   ;;  %s1421_s23 = sld [smem:[#allocation5 + $0x8]] }
  0xa8   :  { %s148_s22 = sshll.u32 %s1261_s18, 4  ;;  %s1262_s25 = smov [#allocation2 + $0x8]   ;;  %s149_s22 = int_to_ptr.vmem [resolvable:$true] %s148_s22 }
  0xa9   :  { %s164_s26 = sshll.u32 %s1262_s25, 4  ;;  %s1423_s28 = sld [smem:[#allocation5 + $0x9]]  ;;  %s1426_s26 = int_to_ptr.vmem [resolvable:$true] %s164_s26 }
  0xaa   :  { %s760_s29 = sshll.u32 %s1406_s0, 4 }
  0xab   :  { %s139_s3 = scalar_lea.hbm %s1576_s1, %s760_s29 }
  0xac   :  { %s1009_s4 = scalar_lea.hbm %s139_s3, 16  ;;  %p1012_p4 = scmp.lt.u32.totalorder %s139_s3, %s1576_s1 }
  0xad   :  { %p1010_p3 = scmp.ne.s32.totalorder %s139_s3, %s1009_s4  ;;  %p1013_p5 = scmp.lt.u32.totalorder %s1319_s8, %s1009_s4 }
  0xae   :  { %p1015_p7 = scmp.lt.u32.totalorder %s1009_s4, %s139_s3 }
  0xaf   :  { %p1014_p6 = por %p1013_p5, %p1012_p4 }
  0xb1   :  { %p1016_p8 = por %p1015_p7, %p1014_p6 }
  0xb3   :  { %p1017_p9 = pnand %p1016_p8, %p1010_p3 }
  0xb5   :  { %1020 = shalt.err (!%p1017_p9)  }
  0xb6   :  { %s1021_s6 = scalar_lea.vmem %s149_s22, 16  ;;  %p1026_p11 = scmp.lt.s32.totalorder %s149_s22, %s1302_s21 }
  0xb7   :  { %p1022_p10 = scmp.ne.s32.totalorder %s149_s22, %s1021_s6  ;;  %p1027_p12 = scmp.lt.s32.totalorder %s1328_s12, %s1021_s6 }
  0xb9   :  { %p1028_p13 = por %p1027_p12, %p1026_p11 }
  0xbb   :  { %p1029_p0 = pnand %p1028_p13, %p1022_p10 }
  0xbd   :  { %1032 = shalt.err (!%p1029_p0)  }
  0xbe   :  { %151 = dma.hbm_to_vmem [thread:$0]  %s139_s3, 16, %s149_s22, [#allocation3] }
  0xbf   :  { %s762_s7 = sshll.u32 %s1421_s23, 4  ;;  %s1263_s9 = smov [#allocation2 + $0x9]  }
  0xc0   :  { %s180_s10 = sshll.u32 %s1263_s9, 4  ;;  %s155_s13 = scalar_lea.hbm %s1576_s1, %s762_s7  ;;  %s1441_s10 = int_to_ptr.vmem [resolvable:$true] %s180_s10 }
  0xc1   :  { %s1033_s14 = scalar_lea.hbm %s155_s13, 16  ;;  %p1036_p2 = scmp.lt.u32.totalorder %s155_s13, %s1576_s1 }
  0xc2   :  { %p1034_p1 = scmp.ne.s32.totalorder %s155_s13, %s1033_s14  ;;  %p1037_p3 = scmp.lt.u32.totalorder %s1319_s8, %s1033_s14 }
  0xc3   :  { %p1039_p5 = scmp.lt.u32.totalorder %s1033_s14, %s155_s13 }
  0xc4   :  { %p1038_p4 = por %p1037_p3, %p1036_p2 }
  0xc6   :  { %p1040_p6 = por %p1039_p5, %p1038_p4 }
  0xc8   :  { %p1041_p7 = pnand %p1040_p6, %p1034_p1 }
  0xca   :  { %1044 = shalt.err (!%p1041_p7)  }
  0xcb   :  { %s1045_s19 = scalar_lea.vmem %s1426_s26, 16  ;;  %p1050_p9 = scmp.lt.s32.totalorder %s1426_s26, %s1302_s21 }
  0xcc   :  { %p1046_p8 = scmp.ne.s32.totalorder %s1426_s26, %s1045_s19  ;;  %p1051_p10 = scmp.lt.s32.totalorder %s1328_s12, %s1045_s19 }
  0xce   :  { %p1052_p11 = por %p1051_p10, %p1050_p9 }
  0xd0   :  { %p1053_p12 = pnand %p1052_p11, %p1046_p8 }
  0xd2   :  { %1056 = shalt.err (!%p1053_p12)  }
  0xd3   :  { %167 = dma.hbm_to_vmem [thread:$0]  %s155_s13, 16, %s1426_s26, [#allocation3] }
  0xd4   :  { %s764_s20 = sshll.u32 %s1423_s28, 4  ;;  %s1454_s17 = sld [smem:[#allocation5 + $0xa]] }
  0xd5   :  { %s171_s23 = scalar_lea.hbm %s1576_s1, %s764_s20 }
  0xd6   :  { %s1057_s25 = scalar_lea.hbm %s171_s23, 16  ;;  %p1060_p0 = scmp.lt.u32.totalorder %s171_s23, %s1576_s1 }
  0xd7   :  { %p1058_p13 = scmp.ne.s32.totalorder %s171_s23, %s1057_s25  ;;  %p1061_p1 = scmp.lt.u32.totalorder %s1319_s8, %s1057_s25 }
  0xd8   :  { %p1063_p3 = scmp.lt.u32.totalorder %s1057_s25, %s171_s23 }
  0xd9   :  { %p1062_p2 = por %p1061_p1, %p1060_p0 }
  0xdb   :  { %p1064_p4 = por %p1063_p3, %p1062_p2 }
  0xdd   :  { %p1065_p5 = pnand %p1064_p4, %p1058_p13 }
  0xdf   :  { %1068 = shalt.err (!%p1065_p5)  }
  0xe0   :  { %s1069_s26 = scalar_lea.vmem %s1441_s10, 16  ;;  %p1074_p7 = scmp.lt.s32.totalorder %s1441_s10, %s1302_s21 }
  0xe1   :  { %p1070_p6 = scmp.ne.s32.totalorder %s1441_s10, %s1069_s26  ;;  %p1075_p8 = scmp.lt.s32.totalorder %s1328_s12, %s1069_s26 }
  0xe3   :  { %p1076_p9 = por %p1075_p8, %p1074_p7 }
  0xe5   :  { %p1077_p10 = pnand %p1076_p9, %p1070_p6 }
  0xe7   :  { %1080 = shalt.err (!%p1077_p10)  }
  0xe8   :  { %183 = dma.hbm_to_vmem [thread:$0]  %s171_s23, 16, %s1441_s10, [#allocation3] }
  0xe9   :  { %s1264_s28 = smov [#allocation2 + $0xa]   ;;  %s1469_s3 = sld [smem:[#allocation5 + $0xb]] }
  0xea   :  { %s196_s24 = sshll.u32 %s1264_s28, 4  ;;  %s1265_s4 = smov [#allocation2 + $0xb]   ;;  %s197_s24 = int_to_ptr.vmem [resolvable:$true] %s196_s24 }
  0xeb   :  { %s212_s5 = sshll.u32 %s1265_s4, 4  ;;  %s1471_s27 = sld [smem:[#allocation5 + $0xc]]  ;;  %s1474_s5 = int_to_ptr.vmem [resolvable:$true] %s212_s5 }
  0xec   :  { %s766_s6 = sshll.u32 %s1454_s17, 4 }
  0xed   :  { %s187_s11 = scalar_lea.hbm %s1576_s1, %s766_s6 }
  0xee   :  { %s1081_s0 = scalar_lea.hbm %s187_s11, 16  ;;  %p1084_p12 = scmp.lt.u32.totalorder %s187_s11, %s1576_s1 }
  0xef   :  { %p1082_p11 = scmp.ne.s32.totalorder %s187_s11, %s1081_s0  ;;  %p1085_p13 = scmp.lt.u32.totalorder %s1319_s8, %s1081_s0 }
  0xf0   :  { %p1087_p1 = scmp.lt.u32.totalorder %s1081_s0, %s187_s11 }
  0xf1   :  { %p1086_p0 = por %p1085_p13, %p1084_p12 }
  0xf3   :  { %p1088_p2 = por %p1087_p1, %p1086_p0 }
  0xf5   :  { %p1089_p3 = pnand %p1088_p2, %p1082_p11 }
  0xf7   :  { %1092 = shalt.err (!%p1089_p3)  }
  0xf8   :  { %s1093_s14 = scalar_lea.vmem %s197_s24, 16  ;;  %p1098_p5 = scmp.lt.s32.totalorder %s197_s24, %s1302_s21 }
  0xf9   :  { %p1094_p4 = scmp.ne.s32.totalorder %s197_s24, %s1093_s14  ;;  %p1099_p6 = scmp.lt.s32.totalorder %s1328_s12, %s1093_s14 }
  0xfb   :  { %p1100_p7 = por %p1099_p6, %p1098_p5 }
  0xfd   :  { %p1101_p8 = pnand %p1100_p7, %p1094_p4 }
  0xff   :  { %1104 = shalt.err (!%p1101_p8)  }
 0x100   :  { %199 = dma.hbm_to_vmem [thread:$0]  %s187_s11, 16, %s197_s24, [#allocation3] }
 0x101   :  { %s768_s15 = sshll.u32 %s1469_s3, 4  ;;  %s1266_s16 = smov [#allocation2 + $0xc]  }
 0x102   :  { %s228_s19 = sshll.u32 %s1266_s16, 4  ;;  %s203_s18 = scalar_lea.hbm %s1576_s1, %s768_s15  ;;  %s1489_s19 = int_to_ptr.vmem [resolvable:$true] %s228_s19 }
 0x103   :  { %s1105_s22 = scalar_lea.hbm %s203_s18, 16  ;;  %p1108_p10 = scmp.lt.u32.totalorder %s203_s18, %s1576_s1 }
 0x104   :  { %p1106_p9 = scmp.ne.s32.totalorder %s203_s18, %s1105_s22  ;;  %p1109_p11 = scmp.lt.u32.totalorder %s1319_s8, %s1105_s22 }
 0x105   :  { %p1111_p13 = scmp.lt.u32.totalorder %s1105_s22, %s203_s18 }
 0x106   :  { %p1110_p12 = por %p1109_p11, %p1108_p10 }
 0x108   :  { %p1112_p0 = por %p1111_p13, %p1110_p12 }
 0x10a   :  { %p1113_p1 = pnand %p1112_p0, %p1106_p9 }
 0x10c   :  { %1116 = shalt.err (!%p1113_p1)  }
 0x10d   :  { %s1117_s29 = scalar_lea.vmem %s1474_s5, 16  ;;  %p1122_p3 = scmp.lt.s32.totalorder %s1474_s5, %s1302_s21 }
 0x10e   :  { %p1118_p2 = scmp.ne.s32.totalorder %s1474_s5, %s1117_s29  ;;  %p1123_p4 = scmp.lt.s32.totalorder %s1328_s12, %s1117_s29 }
 0x110   :  { %p1124_p5 = por %p1123_p4, %p1122_p3 }
 0x112   :  { %p1125_p6 = pnand %p1124_p5, %p1118_p2 }
 0x114   :  { %1128 = shalt.err (!%p1125_p6)  }
 0x115   :  { %215 = dma.hbm_to_vmem [thread:$0]  %s203_s18, 16, %s1474_s5, [#allocation3] }
 0x116   :  { %s770_s30 = sshll.u32 %s1471_s27, 4  ;;  %s1502_s26 = sld [smem:[#allocation5 + $0xd]] }
 0x117   :  { %s219_s3 = scalar_lea.hbm %s1576_s1, %s770_s30 }
 0x118   :  { %s1129_s4 = scalar_lea.hbm %s219_s3, 16  ;;  %p1132_p8 = scmp.lt.u32.totalorder %s219_s3, %s1576_s1 }
 0x119   :  { %p1130_p7 = scmp.ne.s32.totalorder %s219_s3, %s1129_s4  ;;  %p1133_p9 = scmp.lt.u32.totalorder %s1319_s8, %s1129_s4 }
 0x11a   :  { %p1135_p11 = scmp.lt.u32.totalorder %s1129_s4, %s219_s3 }
 0x11b   :  { %p1134_p10 = por %p1133_p9, %p1132_p8 }
 0x11d   :  { %p1136_p12 = por %p1135_p11, %p1134_p10 }
 0x11f   :  { %p1137_p13 = pnand %p1136_p12, %p1130_p7 }
 0x121   :  { %1140 = shalt.err (!%p1137_p13)  }
 0x122   :  { %s1141_s5 = scalar_lea.vmem %s1489_s19, 16  ;;  %p1146_p1 = scmp.lt.s32.totalorder %s1489_s19, %s1302_s21 }
 0x123   :  { %p1142_p0 = scmp.ne.s32.totalorder %s1489_s19, %s1141_s5  ;;  %p1147_p2 = scmp.lt.s32.totalorder %s1328_s12, %s1141_s5 }
 0x125   :  { %p1148_p3 = por %p1147_p2, %p1146_p1 }
 0x127   :  { %p1149_p4 = pnand %p1148_p3, %p1142_p0 }
 0x129   :  { %1152 = shalt.err (!%p1149_p4)  }
 0x12a   :  { %231 = dma.hbm_to_vmem [thread:$0]  %s219_s3, 16, %s1489_s19, [#allocation3] }
 0x12b   :  { %s1267_s27 = smov [#allocation2 + $0xd]   ;;  %s1517_s11 = sld [smem:[#allocation5 + $0xe]] }
 0x12c   :  { %s244_s9 = sshll.u32 %s1267_s27, 4  ;;  %s1268_s0 = smov [#allocation2 + $0xe]   ;;  %s245_s9 = int_to_ptr.vmem [resolvable:$true] %s244_s9 }
 0x12d   :  { %s260_s13 = sshll.u32 %s1268_s0, 4  ;;  %s1519_s10 = sld [smem:[#allocation5 + $0xf]]  ;;  %s1522_s13 = int_to_ptr.vmem [resolvable:$true] %s260_s13 }
 0x12e   :  { %s772_s14 = sshll.u32 %s1502_s26, 4 }
 0x12f   :  { %s235_s20 = scalar_lea.hbm %s1576_s1, %s772_s14 }
 0x130   :  { %s1153_s17 = scalar_lea.hbm %s235_s20, 16  ;;  %p1156_p6 = scmp.lt.u32.totalorder %s235_s20, %s1576_s1 }
 0x131   :  { %p1154_p5 = scmp.ne.s32.totalorder %s235_s20, %s1153_s17  ;;  %p1157_p7 = scmp.lt.u32.totalorder %s1319_s8, %s1153_s17 }
 0x132   :  { %p1159_p9 = scmp.lt.u32.totalorder %s1153_s17, %s235_s20 }
 0x133   :  { %p1158_p8 = por %p1157_p7, %p1156_p6 }
 0x135   :  { %p1160_p10 = por %p1159_p9, %p1158_p8 }
 0x137   :  { %p1161_p11 = pnand %p1160_p10, %p1154_p5 }
 0x139   :  { %1164 = shalt.err (!%p1161_p11)  }
 0x13a   :  { %s1165_s22 = scalar_lea.vmem %s245_s9, 16  ;;  %p1170_p13 = scmp.lt.s32.totalorder %s245_s9, %s1302_s21 }
 0x13b   :  { %p1166_p12 = scmp.ne.s32.totalorder %s245_s9, %s1165_s22  ;;  %p1171_p0 = scmp.lt.s32.totalorder %s1328_s12, %s1165_s22 }
 0x13d   :  { %p1172_p1 = por %p1171_p0, %p1170_p13 }
 0x13f   :  { %p1173_p2 = pnand %p1172_p1, %p1166_p12 }
 0x141   :  { %1176 = shalt.err (!%p1173_p2)  }
 0x142   :  { %247 = dma.hbm_to_vmem [thread:$0]  %s235_s20, 16, %s245_s9, [#allocation3] }
 0x143   :  { %s774_s23 = sshll.u32 %s1517_s11, 4  ;;  %s1269_s25 = smov [#allocation2 + $0xf]  }
 0x144   :  { %s276_s29 = sshll.u32 %s1269_s25, 4  ;;  %s251_s28 = scalar_lea.hbm %s1576_s1, %s774_s23  ;;  %s1537_s29 = int_to_ptr.vmem [resolvable:$true] %s276_s29 }
 0x145   :  { %s1177_s24 = scalar_lea.hbm %s251_s28, 16  ;;  %p1180_p4 = scmp.lt.u32.totalorder %s251_s28, %s1576_s1 }
 0x146   :  { %p1178_p3 = scmp.ne.s32.totalorder %s251_s28, %s1177_s24  ;;  %p1181_p5 = scmp.lt.u32.totalorder %s1319_s8, %s1177_s24 }
 0x147   :  { %p1183_p7 = scmp.lt.u32.totalorder %s1177_s24, %s251_s28 }
 0x148   :  { %p1182_p6 = por %p1181_p5, %p1180_p4 }
 0x14a   :  { %p1184_p8 = por %p1183_p7, %p1182_p6 }
 0x14c   :  { %p1185_p9 = pnand %p1184_p8, %p1178_p3 }
 0x14e   :  { %1188 = shalt.err (!%p1185_p9)  }
 0x14f   :  { %s1189_s6 = scalar_lea.vmem %s1522_s13, 16  ;;  %p1194_p11 = scmp.lt.s32.totalorder %s1522_s13, %s1302_s21 }
 0x150   :  { %p1190_p10 = scmp.ne.s32.totalorder %s1522_s13, %s1189_s6  ;;  %p1195_p12 = scmp.lt.s32.totalorder %s1328_s12, %s1189_s6 }
 0x152   :  { %p1196_p13 = por %p1195_p12, %p1194_p11 }
 0x154   :  { %p1197_p0 = pnand %p1196_p13, %p1190_p10 }
 0x156   :  { %1200 = shalt.err (!%p1197_p0)  }
 0x157   :  { %263 = dma.hbm_to_vmem [thread:$0]  %s251_s28, 16, %s1522_s13, [#allocation3] }
 0x158   :  { %s776_s7 = sshll.u32 %s1519_s10, 4 }
 0x159   :  { %s267_s9 = scalar_lea.hbm %s1576_s1, %s776_s7 }
 0x15a   :  { %s1201_s11 = scalar_lea.hbm %s267_s9, 16  ;;  %p1204_p2 = scmp.lt.u32.totalorder %s267_s9, %s1576_s1 }
 0x15b   :  { %p1202_p1 = scmp.ne.s32.totalorder %s267_s9, %s1201_s11  ;;  %p1205_p3 = scmp.lt.u32.totalorder %s1319_s8, %s1201_s11 }
 0x15c   :  { %p1207_p5 = scmp.lt.u32.totalorder %s1201_s11, %s267_s9 }
 0x15d   :  { %p1206_p4 = por %p1205_p3, %p1204_p2 }
 0x15f   :  { %p1208_p6 = por %p1207_p5, %p1206_p4 }
 0x161   :  { %p1209_p7 = pnand %p1208_p6, %p1202_p1 }
 0x163   :  { %1212 = shalt.err (!%p1209_p7)  }
 0x164   :  { %s1213_s13 = scalar_lea.vmem %s1537_s29, 16  ;;  %p1218_p9 = scmp.lt.s32.totalorder %s1537_s29, %s1302_s21 }
 0x165   :  { %p1214_p8 = scmp.ne.s32.totalorder %s1537_s29, %s1213_s13  ;;  %p1219_p10 = scmp.lt.s32.totalorder %s1328_s12, %s1213_s13 }
 0x167   :  { %p1220_p11 = por %p1219_p10, %p1218_p9 }
 0x169   :  { %p1221_p12 = pnand %p1220_p11, %p1214_p8 }
 0x16b   :  { %1224 = shalt.err (!%p1221_p12)  }
 0x16c   :  { %279 = dma.hbm_to_vmem [thread:$0]  %s267_s9, 16, %s1537_s29, [#allocation3] }
 0x16d   :  { %1249 = dma.done.wait [#allocation3], 256 }
 0x16e   :  { %1250 = vsyncadd [#allocation3], 4294967040  ;;  %s1270_s1 = smov [#allocation6]   ;;  %v596_v0 = vld [vmem:[#allocation2] sm:$0xff]  ;;  %v597_v1 = vld [vmem:[#allocation2 + $0x8] sm:$0xff] }
 0x16f   :  { %s607_s8 = sshll.u32 %s1270_s1, 4  ;;  %v598_v2 = vmul.f32 11.313708, %v596_v0  ;;  %v599_v3 = vmul.f32 11.313708, %v597_v1  ;;  %s608_s8 = int_to_ptr.vmem [resolvable:$true] %s607_s8 }
 0x170   :  { %s1225_s10 = scalar_lea.vmem %s608_s8, 256  ;;  %p1230_p0 = scmp.lt.s32.totalorder %s608_s8, %s608_s8 }
 0x171   :  { %600 = vst [vmem:[#allocation6] sm:$0xff] %v598_v2  ;;  %601 = vst [vmem:[#allocation6 + $0x8] sm:$0xff] %v599_v3  ;;  %p1226_p13 = scmp.ne.s32.totalorder %s608_s8, %s1225_s10  ;;  %p1231_p1 = scmp.lt.s32.totalorder %s1225_s10, %s1225_s10 }
 0x173   :  { %p1232_p2 = por %p1231_p1, %p1230_p0 }
 0x175   :  { %p1233_p3 = pnand %p1232_p2, %p1226_p13 }
 0x177   :  { %1236 = shalt.err (!%p1233_p3)
}
 0x178   :  { %s1237_s15 = scalar_lea.hbm %s1577_s2, 256 }
 0x179   :  { %p1238_p4 = scmp.ne.s32.totalorder %s1577_s2, %s1237_s15  ;;  %p1241_p5 = scmp.lt.u32.totalorder %s1237_s15, %s1577_s2 }
 0x17b   :  { %p1243_p6 = pnand %p1241_p5, %p1238_p4 }
 0x17d   :  { %1246 = shalt.err (!%p1243_p6)
}
 0x17e   :  { %s1271_s19 = smov 128   ;;  %s1272_s22 = smov 8  }
 0x17f   :  { %613 = dma.vmem_to_hbm [thread:$0]  %s608_s8, 256, %s1577_s2, [#allocation7], %s1271_s19, %s1271_s19, %s1272_s22  }
 0x180   :  { %1251 = dma.done.wait [#allocation7], 256  }
 0x181   :  { %1252 = vsyncadd [#allocation7], 4294967040 }
 0x182   :  { %617 = vsyncpa [#allocation7], 1 }
 0x183   :  { %618 = vsyncmov [#allocation3] }
 0x186   :  { %s619_s29 = vpop.sfrf %618 }
 0x187   :  { %p809_p7 = scmp.ne.s32.totalorder %s619_s29, 0 }
 0x189   :  { %623 = shalt.err (%p809_p7)  }
 0x18a   :  { %625 = vsyncmov [#allocation3 + $0x1] }
 0x18d   :  { %s626_s30 = vpop.sfrf %625 }
 0x18e   :  { %p810_p8 = scmp.ne.s32.totalorder %s626_s30, 0 }
 0x190   :  { %630 = shalt.err (%p810_p8)  }

</bundles_post_ra>
